<compile_context>
chip_gen: v6e
topology: v6e:2x2x1
jax: 0.10.0
libtpu: 0.0.40
codegen_flags: <defaults>
</compile_context>

<pallas_src>
import jax
import jax.numpy as jnp
import numpy as np
from jax.experimental import pallas as pl
from jax.experimental.pallas import tpu as pltpu


def ultra_one_kernel(x_ref, halo_ref, w1_ref, w2_ref, pw_ref, o_ref, z_ref):
    f32 = jnp.float32
    _, C, TH, W = x_ref.shape
    O = o_ref.shape[1]

    # Lane-border masks for the horizontal (1,3) tap: zero padding at w=0 / w=W-1.
    lane = jax.lax.broadcasted_iota(jnp.int32, (TH, W), 1)
    not_left = lane != 0
    not_right = lane != W - 1

    # --- Stage 1+2: depthwise (3,1) then (1,3), per channel, into VMEM scratch.
    # C is small here; keep the loop unrolled (switch to lax.fori_loop if C >~ 16).
    for c in range(C):
        xc = x_ref[0, c].astype(f32)                     # (TH, W)
        topc = halo_ref[0, 0, c, 0:1, :].astype(f32)     # (1, W): row above tile
        botc = halo_ref[0, 0, c, 1:2, :].astype(f32)     # (1, W): row below tile

        # Vertical tap (sublane axis): shifted slices + halo rows (zero at the
        # image border is baked into the halo arrays).
        x_up = jnp.concatenate([topc, xc[:TH - 1]], axis=0)   # x[h-1]
        x_dn = jnp.concatenate([xc[1:], botc], axis=0)        # x[h+1]
        yc = (w1_ref[0, c] * x_up
              + w1_ref[1, c] * xc
              + w1_ref[2, c] * x_dn)

        # Horizontal tap (lane axis): XLU rolls + border mask + scalar FMAs.
        # (Replaces the old (W,W) banded MXU matmul.)  roll by W-1 == roll by -1.
        y_l = pltpu.roll(yc, 1, axis=1)                       # y[:, w-1]
        y_r = pltpu.roll(yc, W - 1, axis=1)                   # y[:, w+1]
        z_ref[c] = (w2_ref[0, c] * jnp.where(not_left, y_l, 0.0)
                    + w2_ref[1, c] * yc
                    + w2_ref[2, c] * jnp.where(not_right, y_r, 0.0))

    # --- Stage 3: 1x1 pointwise.  o outer / c inner: one live accumulator,
    # each output plane written exactly once.
    for o in range(O):
        acc = pw_ref[o, 0] * z_ref[0]
        for c in range(1, C):
            acc = acc + pw_ref[o, c] * z_ref[c]
        o_ref[0, o] = acc.astype(o_ref.dtype)


def _tpu_vmem_capacity_bytes():
    """Physical VMEM per TensorCore; conservative fallback (v7x) if unknown."""
    try:
        info = pltpu.get_tpu_info()
        cap = getattr(info, "vmem_capacity_bytes", None)
        if cap:
            return int(cap)
    except Exception:
        pass
    return 64 * 1024 * 1024


def _pick_tile_h(H, W, C, O, itemsize, budget_bytes):
    """Largest TH dividing H with TH % 8 == 0 (or TH == H) whose per-step VMEM
    footprint fits the budget.  Footprint per row of TH:
      - double-buffered input block  : 2 * C * W * itemsize
      - double-buffered output block : 2 * O * W * itemsize
      - (C, TH, W) f32 z scratch     : C * W * 4
      - live f32 temporaries         : ~8 * W * 4
    (halo blocks are TH-independent and tiny)."""
    cands = [t for t in range(H, 0, -1) if H % t == 0 and (t % 8 == 0 or t == H)]
    per_row = W * (2 * (C + O) * itemsize + (C + 8) * 4)
    for t in cands:
        if t * per_row <= budget_bytes:
            return t
    return cands[-1]


def ultra_one_forward(x, w_conv1, w_conv2, w_pointwise, *, tile_h=None):
    """x: (N, Cin, H, W) NCHW.  Weights in PyTorch Conv2d layouts:
       w_conv1 (Cin,1,3,1), w_conv2 (Cin,1,1,3), w_pointwise (Cout,Cin,1,1)."""
    N, C, H, W = x.shape
    O = w_pointwise.shape[0]
    itemsize = jnp.dtype(x.dtype).itemsize

    # Generation-aware VMEM budgeting.
    cap = _tpu_vmem_capacity_bytes()
    budget = min(cap // 2, 48 * 1024 * 1024)           # tile-pick budget
    vmem_limit = int(min(cap * 3 // 4, budget + 16 * 1024 * 1024))

    if tile_h is None:
        TH = _pick_tile_h(H, W, C, O, itemsize, budget)
        # v7x megacore: make sure the grid has >= 2 steps so both TensorCores
        # get work (no-op whenever N >= 2; harmless on single-core v5e/v6e).
        if N == 1 and TH == H and H % 16 == 0:
            TH = H // 2
    else:
        TH = int(tile_h)
    if H % TH != 0 or not (TH % 8 == 0 or TH == H):
        raise ValueError(f"tile_h={TH} must divide H={H} and be a multiple of 8 (or == H)")
    n_h = H // TH

    # Per-tile halo rows for the vertical tap (zero rows at the image border),
    # merged into a single (N, n_h, C, 2, W) array -> one small DMA per step.
    zrow = jnp.zeros((N, C, 1, W), x.dtype)
    if n_h > 1:
        above = x[:, :, TH - 1:H - 1:TH, :]            # last row of tile t-1
        below = x[:, :, TH:H:TH, :]                    # first row of tile t+1
        top = jnp.concatenate([zrow, above], axis=2)   # (N, C, n_h, W)
        bot = jnp.concatenate([below, zrow], axis=2)
    else:
        top, bot = zrow, zrow
    halo = jnp.stack([top, bot], axis=3)               # (N, C, n_h, 2, W)
    halo = jnp.transpose(halo, (0, 2, 1, 3, 4))        # (N, n_h, C, 2, W)

    # Scalar weight tables for SMEM: (3, Cin), (3, Cin), (Cout, Cin).
    w1 = jnp.transpose(w_conv1.reshape(C, 3), (1, 0)).astype(jnp.float32)
    w2 = jnp.transpose(w_conv2.reshape(C, 3), (1, 0)).astype(jnp.float32)
    pw = w_pointwise.reshape(O, C).astype(jnp.float32)

    return pl.pallas_call(
        ultra_one_kernel,
        out_shape=jax.ShapeDtypeStruct((N, O, H, W), x.dtype),
        grid=(N, n_h),
        in_specs=[
            pl.BlockSpec((1, C, TH, W), lambda n, h: (n, 0, h, 0)),
            pl.BlockSpec((1, 1, C, 2, W), lambda n, h: (n, h, 0, 0, 0)),
            pl.BlockSpec(memory_space=pltpu.MemorySpace.SMEM),
            pl.BlockSpec(memory_space=pltpu.MemorySpace.SMEM),
            pl.BlockSpec(memory_space=pltpu.MemorySpace.SMEM),
        ],
        out_specs=pl.BlockSpec((1, O, TH, W), lambda n, h: (n, 0, h, 0)),
        scratch_shapes=[pltpu.VMEM((C, TH, W), jnp.float32)],
        compiler_params=pltpu.CompilerParams(
            dimension_semantics=("parallel", "parallel"),
            vmem_limit_bytes=vmem_limit),
    )(x, halo, w1, w2, pw)


def ref_forward(x, w_conv1, w_conv2, w_pointwise):
    """Pure-JAX reference in NCHW, mirroring the PyTorch forward exactly."""
    N, C, H, W = x.shape
    w1 = w_conv1.reshape(C, 3)
    w2 = w_conv2.reshape(C, 3)
    pw = w_pointwise.reshape(-1, C)
    xp = jnp.pad(x, ((0, 0), (0, 0), (1, 1), (0, 0)))
    y = (w1[:, 0][None, :, None, None] * xp[:, :, 0:H, :]
         + w1[:, 1][None, :, None, None] * xp[:, :, 1:H + 1, :]
         + w1[:, 2][None, :, None, None] * xp[:, :, 2:H + 2, :])
    yp = jnp.pad(y, ((0, 0), (0, 0), (0, 0), (1, 1)))
    z = (w2[:, 0][None, :, None, None] * yp[:, :, :, 0:W]
         + w2[:, 1][None, :, None, None] * yp[:, :, :, 1:W + 1]
         + w2[:, 2][None, :, None, None] * yp[:, :, :, 2:W + 2])
    return jnp.einsum('nchw,oc->nohw', z, pw,
                      precision=jax.lax.Precision.HIGHEST)


if __name__ == "__main__":
    key = jax.random.PRNGKey(0)
    N, Cin, Cout, H, W = 2, 4, 8, 16, 16
    k1, k2, k3, k4 = jax.random.split(key, 4)

    x = jax.random.normal(k1, (N, Cin, H, W), jnp.float32)
    # Deterministic synthetic parameters (PyTorch Conv2d weight layouts).
    w_conv1 = 0.5 * jax.random.normal(k2, (Cin, 1, 3, 1), jnp.float32)
    w_conv2 = 0.5 * jax.random.normal(k3, (Cin, 1, 1, 3), jnp.float32)
    w_pointwise = 0.5 * jax.random.normal(k4, (Cout, Cin, 1, 1), jnp.float32)

    ref = ref_forward(x, w_conv1, w_conv2, w_pointwise)

    # tile_h=8 exercises the multi-tile (halo) path: 2 H-tiles of 8 rows each.
    out = jax.block_until_ready(
        ultra_one_forward(x, w_conv1, w_conv2, w_pointwise, tile_h=8))
    assert out.shape == (N, Cout, H, W)
    np.testing.assert_allclose(np.asarray(out), np.asarray(ref),
                               rtol=1e-5, atol=1e-5)

    # Auto tile selection (single H tile, no halo rows used).
    out2 = jax.block_until_ready(
        ultra_one_forward(x, w_conv1, w_conv2, w_pointwise))
    np.testing.assert_allclose(np.asarray(out2), np.asarray(ref),
                               rtol=1e-5, atol=1e-5)

    print("KERNEL_OK")
</pallas_src>

<mosaic_0001>
module attributes {stable_mosaic.version = 11 : i64} {
  func.func @ultra_one_kernel(%arg0: i32, %arg1: i32, %arg2: memref<1x4x8x16xf32, #tpu.memory_space<vmem>>, %arg3: memref<1x1x4x2x16xf32, #tpu.memory_space<vmem>>, %arg4: memref<3x4xf32, #tpu.memory_space<smem>>, %arg5: memref<3x4xf32, #tpu.memory_space<smem>>, %arg6: memref<8x4xf32, #tpu.memory_space<smem>>, %arg7: memref<1x8x8x16xf32, #tpu.memory_space<vmem>>, %arg8: memref<4x8x16xf32, #tpu.memory_space<vmem>>) attributes {dimension_semantics = [#tpu.dimension_semantics<parallel>, #tpu.dimension_semantics<parallel>], iteration_bounds = array<i64: 2, 2>, scalar_prefetch = 0 : i64, scratch_operands = 1 : i64, tpu.core_type = #tpu.core_type<tc>, window_params = [{transform_indices = @transform_0, window_bounds = array<i64: 1, 4, 8, 16>}, {transform_indices = @transform_1, window_bounds = array<i64: 1, 1, 4, 2, 16>}, {transform_indices = @transform_2, window_bounds = array<i64: 3, 4>}, {transform_indices = @transform_3, window_bounds = array<i64: 3, 4>}, {transform_indices = @transform_4, window_bounds = array<i64: 8, 4>}, {transform_indices = @transform_5, window_bounds = array<i64: 1, 8, 8, 16>}]} {
    %0 = tpu.iota {dimensions = array<i32: 1>} : vector<8x16xi32>
    %c0_i32 = arith.constant 0 : i32
    %1 = vector.broadcast %c0_i32 : i32 to vector<8x16xi32>
    %2 = arith.cmpi ne, %0, %1 : vector<8x16xi32>
    %c15_i32 = arith.constant 15 : i32
    %3 = vector.broadcast %c15_i32 : i32 to vector<8x16xi32>
    %4 = arith.cmpi ne, %0, %3 : vector<8x16xi32>
    %c0 = arith.constant 0 : index
    %c0_0 = arith.constant 0 : index
    %c0_1 = arith.constant 0 : index
    %c0_2 = arith.constant 0 : index
    %5 = vector.load %arg2[%c0, %c0_0, %c0_1, %c0_2] : memref<1x4x8x16xf32, #tpu.memory_space<vmem>>, vector<1x1x8x16xf32>
    %6 = vector.shape_cast %5 : vector<1x1x8x16xf32> to vector<8x16xf32>
    %c0_3 = arith.constant 0 : index
    %c0_4 = arith.constant 0 : index
    %c0_5 = arith.constant 0 : index
    %c0_6 = arith.constant 0 : index
    %c0_7 = arith.constant 0 : index
    %7 = vector.load %arg3[%c0_3, %c0_4, %c0_5, %c0_6, %c0_7] : memref<1x1x4x2x16xf32, #tpu.memory_space<vmem>>, vector<1x1x1x1x16xf32>
    %8 = vector.shape_cast %7 : vector<1x1x1x1x16xf32> to vector<1x16xf32>
    %c0_8 = arith.constant 0 : index
    %c0_9 = arith.constant 0 : index
    %c0_10 = arith.constant 0 : index
    %c1 = arith.constant 1 : index
    %c0_11 = arith.constant 0 : index
    %9 = vector.load %arg3[%c0_8, %c0_9, %c0_10, %c1, %c0_11] : memref<1x1x4x2x16xf32, #tpu.memory_space<vmem>>, vector<1x1x1x1x16xf32>
    %10 = vector.shape_cast %9 : vector<1x1x1x1x16xf32> to vector<1x16xf32>
    %11 = vector.extract_strided_slice %6 {offsets = [0, 0], sizes = [7, 16], strides = [1, 1]} : vector<8x16xf32> to vector<7x16xf32>
    %12 = tpu.concatenate %8, %11 in 0 : vector<1x16xf32>, vector<7x16xf32> -> vector<8x16xf32>
    %13 = vector.extract_strided_slice %6 {offsets = [1, 0], sizes = [7, 16], strides = [1, 1]} : vector<8x16xf32> to vector<7x16xf32>
    %14 = tpu.concatenate %13, %10 in 0 : vector<7x16xf32>, vector<1x16xf32> -> vector<8x16xf32>
    %c0_12 = arith.constant 0 : index
    %c0_13 = arith.constant 0 : index
    %15 = memref.load %arg4[%c0_12, %c0_13] : memref<3x4xf32, #tpu.memory_space<smem>>
    %16 = vector.broadcast %15 : f32 to vector<8x16xf32>
    %17 = arith.mulf %16, %12 : vector<8x16xf32>
    %c1_14 = arith.constant 1 : index
    %c0_15 = arith.constant 0 : index
    %18 = memref.load %arg4[%c1_14, %c0_15] : memref<3x4xf32, #tpu.memory_space<smem>>
    %19 = vector.broadcast %18 : f32 to vector<8x16xf32>
    %20 = arith.mulf %19, %6 : vector<8x16xf32>
    %21 = arith.addf %17, %20 : vector<8x16xf32>
    %c2 = arith.constant 2 : index
    %c0_16 = arith.constant 0 : index
    %22 = memref.load %arg4[%c2, %c0_16] : memref<3x4xf32, #tpu.memory_space<smem>>
    %23 = vector.broadcast %22 : f32 to vector<8x16xf32>
    %24 = arith.mulf %23, %14 : vector<8x16xf32>
    %25 = arith.addf %21, %24 : vector<8x16xf32>
    %c1_i32 = arith.constant 1 : i32
    %26 = tpu.dynamic_rotate %25 by %c1_i32 dim 1 : vector<8x16xf32>, i32 -> vector<8x16xf32>
    %c15_i32_17 = arith.constant 15 : i32
    %27 = tpu.dynamic_rotate %25 by %c15_i32_17 dim 1 : vector<8x16xf32>, i32 -> vector<8x16xf32>
    %c0_18 = arith.constant 0 : index
    %c0_19 = arith.constant 0 : index
    %28 = memref.load %arg5[%c0_18, %c0_19] : memref<3x4xf32, #tpu.memory_space<smem>>
    %cst = arith.constant 0.000000e+00 : f32
    %29 = vector.broadcast %cst : f32 to vector<8x16xf32>
    %30 = arith.select %2, %26, %29 : vector<8x16xi1>, vector<8x16xf32>
    %31 = vector.broadcast %28 : f32 to vector<8x16xf32>
    %32 = arith.mulf %31, %30 : vector<8x16xf32>
    %c1_20 = arith.constant 1 : index
    %c0_21 = arith.constant 0 : index
    %33 = memref.load %arg5[%c1_20, %c0_21] : memref<3x4xf32, #tpu.memory_space<smem>>
    %34 = vector.broadcast %33 : f32 to vector<8x16xf32>
    %35 = arith.mulf %34, %25 : vector<8x16xf32>
    %36 = arith.addf %32, %35 : vector<8x16xf32>
    %c2_22 = arith.constant 2 : index
    %c0_23 = arith.constant 0 : index
    %37 = memref.load %arg5[%c2_22, %c0_23] : memref<3x4xf32, #tpu.memory_space<smem>>
    %cst_24 = arith.constant 0.000000e+00 : f32
    %38 = vector.broadcast %cst_24 : f32 to vector<8x16xf32>
    %39 = arith.select %4, %27, %38 : vector<8x16xi1>, vector<8x16xf32>
    %40 = vector.broadcast %37 : f32 to vector<8x16xf32>
    %41 = arith.mulf %40, %39 : vector<8x16xf32>
    %42 = arith.addf %36, %41 : vector<8x16xf32>
    %c0_25 = arith.constant 0 : index
    %c0_26 = arith.constant 0 : index
    %c0_27 = arith.constant 0 : index
    %43 = vector.load %arg8[%c0_25, %c0_26, %c0_27] : memref<4x8x16xf32, #tpu.memory_space<vmem>>, vector<1x8x16xf32>
    %44 = vector.shape_cast %43 : vector<1x8x16xf32> to vector<8x16xf32>
    %45 = vector.shape_cast %42 : vector<8x16xf32> to vector<1x8x16xf32>
    tpu.vector_store %arg8[%c0_25, %c0_26, %c0_27], %45 {strides = array<i32>} : memref<4x8x16xf32, #tpu.memory_space<vmem>>, vector<1x8x16xf32>,
    %c0_28 = arith.constant 0 : index
    %c1_29 = arith.constant 1 : index
    %c0_30 = arith.constant 0 : index
    %c0_31 = arith.constant 0 : index
    %46 = vector.load %arg2[%c0_28, %c1_29, %c0_30, %c0_31] : memref<1x4x8x16xf32, #tpu.memory_space<vmem>>, vector<1x1x8x16xf32>
    %47 = vector.shape_cast %46 : vector<1x1x8x16xf32> to vector<8x16xf32>
    %c0_32 = arith.constant 0 : index
    %c0_33 = arith.constant 0 : index
    %c1_34 = arith.constant 1 : index
    %c0_35 = arith.constant 0 : index
    %c0_36 = arith.constant 0 : index
    %48 = vector.load %arg3[%c0_32, %c0_33, %c1_34, %c0_35, %c0_36] : memref<1x1x4x2x16xf32, #tpu.memory_space<vmem>>, vector<1x1x1x1x16xf32>
    %49 = vector.shape_cast %48 : vector<1x1x1x1x16xf32> to vector<1x16xf32>
    %c0_37 = arith.constant 0 : index
    %c0_38 = arith.constant 0 : index
    %c1_39 = arith.constant 1 : index
    %c1_40 = arith.constant 1 : index
    %c0_41 = arith.constant 0 : index
    %50 = vector.load %arg3[%c0_37, %c0_38, %c1_39, %c1_40, %c0_41] : memref<1x1x4x2x16xf32, #tpu.memory_space<vmem>>, vector<1x1x1x1x16xf32>
    %51 = vector.shape_cast %50 : vector<1x1x1x1x16xf32> to vector<1x16xf32>
    %52 = vector.extract_strided_slice %47 {offsets = [0, 0], sizes = [7, 16], strides = [1, 1]} : vector<8x16xf32> to vector<7x16xf32>
    %53 = tpu.concatenate %49, %52 in 0 : vector<1x16xf32>, vector<7x16xf32> -> vector<8x16xf32>
    %54 = vector.extract_strided_slice %47 {offsets = [1, 0], sizes = [7, 16], strides = [1, 1]} : vector<8x16xf32> to vector<7x16xf32>
    %55 = tpu.concatenate %54, %51 in 0 : vector<7x16xf32>, vector<1x16xf32> -> vector<8x16xf32>
    %c0_42 = arith.constant 0 : index
    %c1_43 = arith.constant 1 : index
    %56 = memref.load %arg4[%c0_42, %c1_43] : memref<3x4xf32, #tpu.memory_space<smem>>
    %57 = vector.broadcast %56 : f32 to vector<8x16xf32>
    %58 = arith.mulf %57, %53 : vector<8x16xf32>
    %c1_44 = arith.constant 1 : index
    %c1_45 = arith.constant 1 : index
    %59 = memref.load %arg4[%c1_44, %c1_45] : memref<3x4xf32, #tpu.memory_space<smem>>
    %60 = vector.broadcast %59 : f32 to vector<8x16xf32>
    %61 = arith.mulf %60, %47 : vector<8x16xf32>
    %62 = arith.addf %58, %61 : vector<8x16xf32>
    %c2_46 = arith.constant 2 : index
    %c1_47 = arith.constant 1 : index
    %63 = memref.load %arg4[%c2_46, %c1_47] : memref<3x4xf32, #tpu.memory_space<smem>>
    %64 = vector.broadcast %63 : f32 to vector<8x16xf32>
    %65 = arith.mulf %64, %55 : vector<8x16xf32>
    %66 = arith.addf %62, %65 : vector<8x16xf32>
    %c1_i32_48 = arith.constant 1 : i32
    %67 = tpu.dynamic_rotate %66 by %c1_i32_48 dim 1 : vector<8x16xf32>, i32 -> vector<8x16xf32>
    %c15_i32_49 = arith.constant 15 : i32
    %68 = tpu.dynamic_rotate %66 by %c15_i32_49 dim 1 : vector<8x16xf32>, i32 -> vector<8x16xf32>
    %c0_50 = arith.constant 0 : index
    %c1_51 = arith.constant 1 : index
    %69 = memref.load %arg5[%c0_50, %c1_51] : memref<3x4xf32, #tpu.memory_space<smem>>
    %cst_52 = arith.constant 0.000000e+00 : f32
    %70 = vector.broadcast %cst_52 : f32 to vector<8x16xf32>
    %71 = arith.select %2, %67, %70 : vector<8x16xi1>, vector<8x16xf32>
    %72 = vector.broadcast %69 : f32 to vector<8x16xf32>
    %73 = arith.mulf %72, %71 : vector<8x16xf32>
    %c1_53 = arith.constant 1 : index
    %c1_54 = arith.constant 1 : index
    %74 = memref.load %arg5[%c1_53, %c1_54] : memref<3x4xf32, #tpu.memory_space<smem>>
    %75 = vector.broadcast %74 : f32 to vector<8x16xf32>
    %76 = arith.mulf %75, %66 : vector<8x16xf32>
    %77 = arith.addf %73, %76 : vector<8x16xf32>
    %c2_55 = arith.constant 2 : index
    %c1_56 = arith.constant 1 : index
    %78 = memref.load %arg5[%c2_55, %c1_56] : memref<3x4xf32, #tpu.memory_space<smem>>
    %cst_57 = arith.constant 0.000000e+00 : f32
    %79 = vector.broadcast %cst_57 : f32 to vector<8x16xf32>
    %80 = arith.select %4, %68, %79 : vector<8x16xi1>, vector<8x16xf32>
    %81 = vector.broadcast %78 : f32 to vector<8x16xf32>
    %82 = arith.mulf %81, %80 : vector<8x16xf32>
    %83 = arith.addf %77, %82 : vector<8x16xf32>
    %c1_58 = arith.constant 1 : index
    %c0_59 = arith.constant 0 : index
    %c0_60 = arith.constant 0 : index
    %84 = vector.load %arg8[%c1_58, %c0_59, %c0_60] : memref<4x8x16xf32, #tpu.memory_space<vmem>>, vector<1x8x16xf32>
    %85 = vector.shape_cast %84 : vector<1x8x16xf32> to vector<8x16xf32>
    %86 = vector.shape_cast %83 : vector<8x16xf32> to vector<1x8x16xf32>
    tpu.vector_store %arg8[%c1_58, %c0_59, %c0_60], %86 {strides = array<i32>} : memref<4x8x16xf32, #tpu.memory_space<vmem>>, vector<1x8x16xf32>,
    %c0_61 = arith.constant 0 : index
    %c2_62 = arith.constant 2 : index
    %c0_63 = arith.constant 0 : index
    %c0_64 = arith.constant 0 : index
    %87 = vector.load %arg2[%c0_61, %c2_62, %c0_63, %c0_64] : memref<1x4x8x16xf32, #tpu.memory_space<vmem>>, vector<1x1x8x16xf32>
    %88 = vector.shape_cast %87 : vector<1x1x8x16xf32> to vector<8x16xf32>
    %c0_65 = arith.constant 0 : index
    %c0_66 = arith.constant 0 : index
    %c2_67 = arith.constant 2 : index
    %c0_68 = arith.constant 0 : index
    %c0_69 = arith.constant 0 : index
    %89 = vector.load %arg3[%c0_65, %c0_66, %c2_67, %c0_68, %c0_69] : memref<1x1x4x2x16xf32, #tpu.memory_space<vmem>>, vector<1x1x1x1x16xf32>
    %90 = vector.shape_cast %89 : vector<1x1x1x1x16xf32> to vector<1x16xf32>
    %c0_70 = arith.constant 0 : index
    %c0_71 = arith.constant 0 : index
    %c2_72 = arith.constant 2 : index
    %c1_73 = arith.constant 1 : index
    %c0_74 = arith.constant 0 : index
    %91 = vector.load %arg3[%c0_70, %c0_71, %c2_72, %c1_73, %c0_74] : memref<1x1x4x2x16xf32, #tpu.memory_space<vmem>>, vector<1x1x1x1x16xf32>
    %92 = vector.shape_cast %91 : vector<1x1x1x1x16xf32> to vector<1x16xf32>
    %93 = vector.extract_strided_slice %88 {offsets = [0, 0], sizes = [7, 16], strides = [1, 1]} : vector<8x16xf32> to vector<7x16xf32>
    %94 = tpu.concatenate %90, %93 in 0 : vector<1x16xf32>, vector<7x16xf32> -> vector<8x16xf32>
    %95 = vector.extract_strided_slice %88 {offsets = [1, 0], sizes = [7, 16], strides = [1, 1]} : vector<8x16xf32> to vector<7x16xf32>
    %96 = tpu.concatenate %95, %92 in 0 : vector<7x16xf32>, vector<1x16xf32> -> vector<8x16xf32>
    %c0_75 = arith.constant 0 : index
    %c2_76 = arith.constant 2 : index
    %97 = memref.load %arg4[%c0_75, %c2_76] : memref<3x4xf32, #tpu.memory_space<smem>>
    %98 = vector.broadcast %97 : f32 to vector<8x16xf32>
    %99 = arith.mulf %98, %94 : vector<8x16xf32>
    %c1_77 = arith.constant 1 : index
    %c2_78 = arith.constant 2 : index
    %100 = memref.load %arg4[%c1_77, %c2_78] : memref<3x4xf32, #tpu.memory_space<smem>>
    %101 = vector.broadcast %100 : f32 to vector<8x16xf32>
    %102 = arith.mulf %101, %88 : vector<8x16xf32>
    %103 = arith.addf %99, %102 : vector<8x16xf32>
    %c2_79 = arith.constant 2 : index
    %c2_80 = arith.constant 2 : index
    %104 = memref.load %arg4[%c2_79, %c2_80] : memref<3x4xf32, #tpu.memory_space<smem>>
    %105 = vector.broadcast %104 : f32 to vector<8x16xf32>
    %106 = arith.mulf %105, %96 : vector<8x16xf32>
    %107 = arith.addf %103, %106 : vector<8x16xf32>
    %c1_i32_81 = arith.constant 1 : i32
    %108 = tpu.dynamic_rotate %107 by %c1_i32_81 dim 1 : vector<8x16xf32>, i32 -> vector<8x16xf32>
    %c15_i32_82 = arith.constant 15 : i32
    %109 = tpu.dynamic_rotate %107 by %c15_i32_82 dim 1 : vector<8x16xf32>, i32 -> vector<8x16xf32>
    %c0_83 = arith.constant 0 : index
    %c2_84 = arith.constant 2 : index
    %110 = memref.load %arg5[%c0_83, %c2_84] : memref<3x4xf32, #tpu.memory_space<smem>>
    %cst_85 = arith.constant 0.000000e+00 : f32
    %111 = vector.broadcast %cst_85 : f32 to vector<8x16xf32>
    %112 = arith.select %2, %108, %111 : vector<8x16xi1>, vector<8x16xf32>
    %113 = vector.broadcast %110 : f32 to vector<8x16xf32>
    %114 = arith.mulf %113, %112 : vector<8x16xf32>
    %c1_86 = arith.constant 1 : index
    %c2_87 = arith.constant 2 : index
    %115 = memref.load %arg5[%c1_86, %c2_87] : memref<3x4xf32, #tpu.memory_space<smem>>
    %116 = vector.broadcast %115 : f32 to vector<8x16xf32>
    %117 = arith.mulf %116, %107 : vector<8x16xf32>
    %118 = arith.addf %114, %117 : vector<8x16xf32>
    %c2_88 = arith.constant 2 : index
    %c2_89 = arith.constant 2 : index
    %119 = memref.load %arg5[%c2_88, %c2_89] : memref<3x4xf32, #tpu.memory_space<smem>>
    %cst_90 = arith.constant 0.000000e+00 : f32
    %120 = vector.broadcast %cst_90 : f32 to vector<8x16xf32>
    %121 = arith.select %4, %109, %120 : vector<8x16xi1>, vector<8x16xf32>
    %122 = vector.broadcast %119 : f32 to vector<8x16xf32>
    %123 = arith.mulf %122, %121 : vector<8x16xf32>
    %124 = arith.addf %118, %123 : vector<8x16xf32>
    %c2_91 = arith.constant 2 : index
    %c0_92 = arith.constant 0 : index
    %c0_93 = arith.constant 0 : index
    %125 = vector.load %arg8[%c2_91, %c0_92, %c0_93] : memref<4x8x16xf32, #tpu.memory_space<vmem>>, vector<1x8x16xf32>
    %126 = vector.shape_cast %125 : vector<1x8x16xf32> to vector<8x16xf32>
    %127 = vector.shape_cast %124 : vector<8x16xf32> to vector<1x8x16xf32>
    tpu.vector_store %arg8[%c2_91, %c0_92, %c0_93], %127 {strides = array<i32>} : memref<4x8x16xf32, #tpu.memory_space<vmem>>, vector<1x8x16xf32>,
    %c0_94 = arith.constant 0 : index
    %c3 = arith.constant 3 : index
    %c0_95 = arith.constant 0 : index
    %c0_96 = arith.constant 0 : index
    %128 = vector.load %arg2[%c0_94, %c3, %c0_95, %c0_96] : memref<1x4x8x16xf32, #tpu.memory_space<vmem>>, vector<1x1x8x16xf32>
    %129 = vector.shape_cast %128 : vector<1x1x8x16xf32> to vector<8x16xf32>
    %c0_97 = arith.constant 0 : index
    %c0_98 = arith.constant 0 : index
    %c3_99 = arith.constant 3 : index
    %c0_100 = arith.constant 0 : index
    %c0_101 = arith.constant 0 : index
    %130 = vector.load %arg3[%c0_97, %c0_98, %c3_99, %c0_100, %c0_101] : memref<1x1x4x2x16xf32, #tpu.memory_space<vmem>>, vector<1x1x1x1x16xf32>
    %131 = vector.shape_cast %130 : vector<1x1x1x1x16xf32> to vector<1x16xf32>
    %c0_102 = arith.constant 0 : index
    %c0_103 = arith.constant 0 : index
    %c3_104 = arith.constant 3 : index
    %c1_105 = arith.constant 1 : index
    %c0_106 = arith.constant 0 : index
    %132 = vector.load %arg3[%c0_102, %c0_103, %c3_104, %c1_105, %c0_106] : memref<1x1x4x2x16xf32, #tpu.memory_space<vmem>>, vector<1x1x1x1x16xf32>
    %133 = vector.shape_cast %132 : vector<1x1x1x1x16xf32> to vector<1x16xf32>
    %134 = vector.extract_strided_slice %129 {offsets = [0, 0], sizes = [7, 16], strides = [1, 1]} : vector<8x16xf32> to vector<7x16xf32>
    %135 = tpu.concatenate %131, %134 in 0 : vector<1x16xf32>, vector<7x16xf32> -> vector<8x16xf32>
    %136 = vector.extract_strided_slice %129 {offsets = [1, 0], sizes = [7, 16], strides = [1, 1]} : vector<8x16xf32> to vector<7x16xf32>
    %137 = tpu.concatenate %136, %133 in 0 : vector<7x16xf32>, vector<1x16xf32> -> vector<8x16xf32>
    %c0_107 = arith.constant 0 : index
    %c3_108 = arith.constant 3 : index
    %138 = memref.load %arg4[%c0_107, %c3_108] : memref<3x4xf32, #tpu.memory_space<smem>>
    %139 = vector.broadcast %138 : f32 to vector<8x16xf32>
    %140 = arith.mulf %139, %135 : vector<8x16xf32>
    %c1_109 = arith.constant 1 : index
    %c3_110 = arith.constant 3 : index
    %141 = memref.load %arg4[%c1_109, %c3_110] : memref<3x4xf32, #tpu.memory_space<smem>>
    %142 = vector.broadcast %141 : f32 to vector<8x16xf32>
    %143 = arith.mulf %142, %129 : vector<8x16xf32>
    %144 = arith.addf %140, %143 : vector<8x16xf32>
    %c2_111 = arith.constant 2 : index
    %c3_112 = arith.constant 3 : index
    %145 = memref.load %arg4[%c2_111, %c3_112] : memref<3x4xf32, #tpu.memory_space<smem>>
    %146 = vector.broadcast %145 : f32 to vector<8x16xf32>
    %147 = arith.mulf %146, %137 : vector<8x16xf32>
    %148 = arith.addf %144, %147 : vector<8x16xf32>
    %c1_i32_113 = arith.constant 1 : i32
    %149 = tpu.dynamic_rotate %148 by %c1_i32_113 dim 1 : vector<8x16xf32>, i32 -> vector<8x16xf32>
    %c15_i32_114 = arith.constant 15 : i32
    %150 = tpu.dynamic_rotate %148 by %c15_i32_114 dim 1 : vector<8x16xf32>, i32 -> vector<8x16xf32>
    %c0_115 = arith.constant 0 : index
    %c3_116 = arith.constant 3 : index
    %151 = memref.load %arg5[%c0_115, %c3_116] : memref<3x4xf32, #tpu.memory_space<smem>>
    %cst_117 = arith.constant 0.000000e+00 : f32
    %152 = vector.broadcast %cst_117 : f32 to vector<8x16xf32>
    %153 = arith.select %2, %149, %152 : vector<8x16xi1>, vector<8x16xf32>
    %154 = vector.broadcast %151 : f32 to vector<8x16xf32>
    %155 = arith.mulf %154, %153 : vector<8x16xf32>
    %c1_118 = arith.constant 1 : index
    %c3_119 = arith.constant 3 : index
    %156 = memref.load %arg5[%c1_118, %c3_119] : memref<3x4xf32, #tpu.memory_space<smem>>
    %157 = vector.broadcast %156 : f32 to vector<8x16xf32>
    %158 = arith.mulf %157, %148 : vector<8x16xf32>
    %159 = arith.addf %155, %158 : vector<8x16xf32>
    %c2_120 = arith.constant 2 : index
    %c3_121 = arith.constant 3 : index
    %160 = memref.load %arg5[%c2_120, %c3_121] : memref<3x4xf32, #tpu.memory_space<smem>>
    %cst_122 = arith.constant 0.000000e+00 : f32
    %161 = vector.broadcast %cst_122 : f32 to vector<8x16xf32>
    %162 = arith.select %4, %150, %161 : vector<8x16xi1>, vector<8x16xf32>
    %163 = vector.broadcast %160 : f32 to vector<8x16xf32>
    %164 = arith.mulf %163, %162 : vector<8x16xf32>
    %165 = arith.addf %159, %164 : vector<8x16xf32>
    %c3_123 = arith.constant 3 : index
    %c0_124 = arith.constant 0 : index
    %c0_125 = arith.constant 0 : index
    %166 = vector.load %arg8[%c3_123, %c0_124, %c0_125] : memref<4x8x16xf32, #tpu.memory_space<vmem>>, vector<1x8x16xf32>
    %167 = vector.shape_cast %166 : vector<1x8x16xf32> to vector<8x16xf32>
    %168 = vector.shape_cast %165 : vector<8x16xf32> to vector<1x8x16xf32>
    tpu.vector_store %arg8[%c3_123, %c0_124, %c0_125], %168 {strides = array<i32>} : memref<4x8x16xf32, #tpu.memory_space<vmem>>, vector<1x8x16xf32>,
    %c0_126 = arith.constant 0 : index
    %c0_127 = arith.constant 0 : index
    %169 = memref.load %arg6[%c0_126, %c0_127] : memref<8x4xf32, #tpu.memory_space<smem>>
    %c0_128 = arith.constant 0 : index
    %c0_129 = arith.constant 0 : index
    %c0_130 = arith.constant 0 : index
    %170 = vector.load %arg8[%c0_128, %c0_129, %c0_130] : memref<4x8x16xf32, #tpu.memory_space<vmem>>, vector<1x8x16xf32>
    %171 = vector.shape_cast %170 : vector<1x8x16xf32> to vector<8x16xf32>
    %172 = vector.broadcast %169 : f32 to vector<8x16xf32>
    %173 = arith.mulf %172, %171 : vector<8x16xf32>
    %c0_131 = arith.constant 0 : index
    %c1_132 = arith.constant 1 : index
    %174 = memref.load %arg6[%c0_131, %c1_132] : memref<8x4xf32, #tpu.memory_space<smem>>
    %c1_133 = arith.constant 1 : index
    %c0_134 = arith.constant 0 : index
    %c0_135 = arith.constant 0 : index
    %175 = vector.load %arg8[%c1_133, %c0_134, %c0_135] : memref<4x8x16xf32, #tpu.memory_space<vmem>>, vector<1x8x16xf32>
    %176 = vector.shape_cast %175 : vector<1x8x16xf32> to vector<8x16xf32>
    %177 = vector.broadcast %174 : f32 to vector<8x16xf32>
    %178 = arith.mulf %177, %176 : vector<8x16xf32>
    %179 = arith.addf %173, %178 : vector<8x16xf32>
    %c0_136 = arith.constant 0 : index
    %c2_137 = arith.constant 2 : index
    %180 = memref.load %arg6[%c0_136, %c2_137] : memref<8x4xf32, #tpu.memory_space<smem>>
    %c2_138 = arith.constant 2 : index
    %c0_139 = arith.constant 0 : index
    %c0_140 = arith.constant 0 : index
    %181 = vector.load %arg8[%c2_138, %c0_139, %c0_140] : memref<4x8x16xf32, #tpu.memory_space<vmem>>, vector<1x8x16xf32>
    %182 = vector.shape_cast %181 : vector<1x8x16xf32> to vector<8x16xf32>
    %183 = vector.broadcast %180 : f32 to vector<8x16xf32>
    %184 = arith.mulf %183, %182 : vector<8x16xf32>
    %185 = arith.addf %179, %184 : vector<8x16xf32>
    %c0_141 = arith.constant 0 : index
    %c3_142 = arith.constant 3 : index
    %186 = memref.load %arg6[%c0_141, %c3_142] : memref<8x4xf32, #tpu.memory_space<smem>>
    %c3_143 = arith.constant 3 : index
    %c0_144 = arith.constant 0 : index
    %c0_145 = arith.constant 0 : index
    %187 = vector.load %arg8[%c3_143, %c0_144, %c0_145] : memref<4x8x16xf32, #tpu.memory_space<vmem>>, vector<1x8x16xf32>
    %188 = vector.shape_cast %187 : vector<1x8x16xf32> to vector<8x16xf32>
    %189 = vector.broadcast %186 : f32 to vector<8x16xf32>
    %190 = arith.mulf %189, %188 : vector<8x16xf32>
    %191 = arith.addf %185, %190 : vector<8x16xf32>
    %c0_146 = arith.constant 0 : index
    %c0_147 = arith.constant 0 : index
    %c0_148 = arith.constant 0 : index
    %c0_149 = arith.constant 0 : index
    %192 = vector.load %arg7[%c0_146, %c0_147, %c0_148, %c0_149] : memref<1x8x8x16xf32, #tpu.memory_space<vmem>>, vector<1x1x8x16xf32>
    %193 = vector.shape_cast %192 : vector<1x1x8x16xf32> to vector<8x16xf32>
    %194 = vector.shape_cast %191 : vector<8x16xf32> to vector<1x1x8x16xf32>
    tpu.vector_store %arg7[%c0_146, %c0_147, %c0_148, %c0_149], %194 {strides = array<i32>} : memref<1x8x8x16xf32, #tpu.memory_space<vmem>>, vector<1x1x8x16xf32>,
    %c1_150 = arith.constant 1 : index
    %c0_151 = arith.constant 0 : index
    %195 = memref.load %arg6[%c1_150, %c0_151] : memref<8x4xf32, #tpu.memory_space<smem>>
    %c0_152 = arith.constant 0 : index
    %c0_153 = arith.constant 0 : index
    %c0_154 = arith.constant 0 : index
    %196 = vector.load %arg8[%c0_152, %c0_153, %c0_154] : memref<4x8x16xf32, #tpu.memory_space<vmem>>, vector<1x8x16xf32>
    %197 = vector.shape_cast %196 : vector<1x8x16xf32> to vector<8x16xf32>
    %198 = vector.broadcast %195 : f32 to vector<8x16xf32>
    %199 = arith.mulf %198, %197 : vector<8x16xf32>
    %c1_155 = arith.constant 1 : index
    %c1_156 = arith.constant 1 : index
    %200 = memref.load %arg6[%c1_155, %c1_156] : memref<8x4xf32, #tpu.memory_space<smem>>
    %c1_157 = arith.constant 1 : index
    %c0_158 = arith.constant 0 : index
    %c0_159 = arith.constant 0 : index
    %201 = vector.load %arg8[%c1_157, %c0_158, %c0_159] : memref<4x8x16xf32, #tpu.memory_space<vmem>>, vector<1x8x16xf32>
    %202 = vector.shape_cast %201 : vector<1x8x16xf32> to vector<8x16xf32>
    %203 = vector.broadcast %200 : f32 to vector<8x16xf32>
    %204 = arith.mulf %203, %202 : vector<8x16xf32>
    %205 = arith.addf %199, %204 : vector<8x16xf32>
    %c1_160 = arith.constant 1 : index
    %c2_161 = arith.constant 2 : index
    %206 = memref.load %arg6[%c1_160, %c2_161] : memref<8x4xf32, #tpu.memory_space<smem>>
    %c2_162 = arith.constant 2 : index
    %c0_163 = arith.constant 0 : index
    %c0_164 = arith.constant 0 : index
    %207 = vector.load %arg8[%c2_162, %c0_163, %c0_164] : memref<4x8x16xf32, #tpu.memory_space<vmem>>, vector<1x8x16xf32>
    %208 = vector.shape_cast %207 : vector<1x8x16xf32> to vector<8x16xf32>
    %209 = vector.broadcast %206 : f32 to vector<8x16xf32>
    %210 = arith.mulf %209, %208 : vector<8x16xf32>
    %211 = arith.addf %205, %210 : vector<8x16xf32>
    %c1_165 = arith.constant 1 : index
    %c3_166 = arith.constant 3 : index
    %212 = memref.load %arg6[%c1_165, %c3_166] : memref<8x4xf32, #tpu.memory_space<smem>>
    %c3_167 = arith.constant 3 : index
    %c0_168 = arith.constant 0 : index
    %c0_169 = arith.constant 0 : index
    %213 = vector.load %arg8[%c3_167, %c0_168, %c0_169] : memref<4x8x16xf32, #tpu.memory_space<vmem>>, vector<1x8x16xf32>
    %214 = vector.shape_cast %213 : vector<1x8x16xf32> to vector<8x16xf32>
    %215 = vector.broadcast %212 : f32 to vector<8x16xf32>
    %216 = arith.mulf %215, %214 : vector<8x16xf32>
    %217 = arith.addf %211, %216 : vector<8x16xf32>
    %c0_170 = arith.constant 0 : index
    %c1_171 = arith.constant 1 : index
    %c0_172 = arith.constant 0 : index
    %c0_173 = arith.constant 0 : index
    %218 = vector.load %arg7[%c0_170, %c1_171, %c0_172, %c0_173] : memref<1x8x8x16xf32, #tpu.memory_space<vmem>>, vector<1x1x8x16xf32>
    %219 = vector.shape_cast %218 : vector<1x1x8x16xf32> to vector<8x16xf32>
    %220 = vector.shape_cast %217 : vector<8x16xf32> to vector<1x1x8x16xf32>
    tpu.vector_store %arg7[%c0_170, %c1_171, %c0_172, %c0_173], %220 {strides = array<i32>} : memref<1x8x8x16xf32, #tpu.memory_space<vmem>>, vector<1x1x8x16xf32>,
    %c2_174 = arith.constant 2 : index
    %c0_175 = arith.constant 0 : index
    %221 = memref.load %arg6[%c2_174, %c0_175] : memref<8x4xf32, #tpu.memory_space<smem>>
    %c0_176 = arith.constant 0 : index
    %c0_177 = arith.constant 0 : index
    %c0_178 = arith.constant 0 : index
    %222 = vector.load %arg8[%c0_176, %c0_177, %c0_178] : memref<4x8x16xf32, #tpu.memory_space<vmem>>, vector<1x8x16xf32>
    %223 = vector.shape_cast %222 : vector<1x8x16xf32> to vector<8x16xf32>
    %224 = vector.broadcast %221 : f32 to vector<8x16xf32>
    %225 = arith.mulf %224, %223 : vector<8x16xf32>
    %c2_179 = arith.constant 2 : index
    %c1_180 = arith.constant 1 : index
    %226 = memref.load %arg6[%c2_179, %c1_180] : memref<8x4xf32, #tpu.memory_space<smem>>
    %c1_181 = arith.constant 1 : index
    %c0_182 = arith.constant 0 : index
    %c0_183 = arith.constant 0 : index
    %227 = vector.load %arg8[%c1_181, %c0_182, %c0_183] : memref<4x8x16xf32, #tpu.memory_space<vmem>>, vector<1x8x16xf32>
    %228 = vector.shape_cast %227 : vector<1x8x16xf32> to vector<8x16xf32>
    %229 = vector.broadcast %226 : f32 to vector<8x16xf32>
    %230 = arith.mulf %229, %228 : vector<8x16xf32>
    %231 = arith.addf %225, %230 : vector<8x16xf32>
    %c2_184 = arith.constant 2 : index
    %c2_185 = arith.constant 2 : index
    %232 = memref.load %arg6[%c2_184, %c2_185] : memref<8x4xf32, #tpu.memory_space<smem>>
    %c2_186 = arith.constant 2 : index
    %c0_187 = arith.constant 0 : index
    %c0_188 = arith.constant 0 : index
    %233 = vector.load %arg8[%c2_186, %c0_187, %c0_188] : memref<4x8x16xf32, #tpu.memory_space<vmem>>, vector<1x8x16xf32>
    %234 = vector.shape_cast %233 : vector<1x8x16xf32> to vector<8x16xf32>
    %235 = vector.broadcast %232 : f32 to vector<8x16xf32>
    %236 = arith.mulf %235, %234 : vector<8x16xf32>
    %237 = arith.addf %231, %236 : vector<8x16xf32>
    %c2_189 = arith.constant 2 : index
    %c3_190 = arith.constant 3 : index
    %238 = memref.load %arg6[%c2_189, %c3_190] : memref<8x4xf32, #tpu.memory_space<smem>>
    %c3_191 = arith.constant 3 : index
    %c0_192 = arith.constant 0 : index
    %c0_193 = arith.constant 0 : index
    %239 = vector.load %arg8[%c3_191, %c0_192, %c0_193] : memref<4x8x16xf32, #tpu.memory_space<vmem>>, vector<1x8x16xf32>
    %240 = vector.shape_cast %239 : vector<1x8x16xf32> to vector<8x16xf32>
    %241 = vector.broadcast %238 : f32 to vector<8x16xf32>
    %242 = arith.mulf %241, %240 : vector<8x16xf32>
    %243 = arith.addf %237, %242 : vector<8x16xf32>
    %c0_194 = arith.constant 0 : index
    %c2_195 = arith.constant 2 : index
    %c0_196 = arith.constant 0 : index
    %c0_197 = arith.constant 0 : index
    %244 = vector.load %arg7[%c0_194, %c2_195, %c0_196, %c0_197] : memref<1x8x8x16xf32, #tpu.memory_space<vmem>>, vector<1x1x8x16xf32>
    %245 = vector.shape_cast %244 : vector<1x1x8x16xf32> to vector<8x16xf32>
    %246 = vector.shape_cast %243 : vector<8x16xf32> to vector<1x1x8x16xf32>
    tpu.vector_store %arg7[%c0_194, %c2_195, %c0_196, %c0_197], %246 {strides = array<i32>} : memref<1x8x8x16xf32, #tpu.memory_space<vmem>>, vector<1x1x8x16xf32>,
    %c3_198 = arith.constant 3 : index
    %c0_199 = arith.constant 0 : index
    %247 = memref.load %arg6[%c3_198, %c0_199] : memref<8x4xf32, #tpu.memory_space<smem>>
    %c0_200 = arith.constant 0 : index
    %c0_201 = arith.constant 0 : index
    %c0_202 = arith.constant 0 : index
    %248 = vector.load %arg8[%c0_200, %c0_201, %c0_202] : memref<4x8x16xf32, #tpu.memory_space<vmem>>, vector<1x8x16xf32>
    %249 = vector.shape_cast %248 : vector<1x8x16xf32> to vector<8x16xf32>
    %250 = vector.broadcast %247 : f32 to vector<8x16xf32>
    %251 = arith.mulf %250, %249 : vector<8x16xf32>
    %c3_203 = arith.constant 3 : index
    %c1_204 = arith.constant 1 : index
    %252 = memref.load %arg6[%c3_203, %c1_204] : memref<8x4xf32, #tpu.memory_space<smem>>
    %c1_205 = arith.constant 1 : index
    %c0_206 = arith.constant 0 : index
    %c0_207 = arith.constant 0 : index
    %253 = vector.load %arg8[%c1_205, %c0_206, %c0_207] : memref<4x8x16xf32, #tpu.memory_space<vmem>>, vector<1x8x16xf32>
    %254 = vector.shape_cast %253 : vector<1x8x16xf32> to vector<8x16xf32>
    %255 = vector.broadcast %252 : f32 to vector<8x16xf32>
    %256 = arith.mulf %255, %254 : vector<8x16xf32>
    %257 = arith.addf %251, %256 : vector<8x16xf32>
    %c3_208 = arith.constant 3 : index
    %c2_209 = arith.constant 2 : index
    %258 = memref.load %arg6[%c3_208, %c2_209] : memref<8x4xf32, #tpu.memory_space<smem>>
    %c2_210 = arith.constant 2 : index
    %c0_211 = arith.constant 0 : index
    %c0_212 = arith.constant 0 : index
    %259 = vector.load %arg8[%c2_210, %c0_211, %c0_212] : memref<4x8x16xf32, #tpu.memory_space<vmem>>, vector<1x8x16xf32>
    %260 = vector.shape_cast %259 : vector<1x8x16xf32> to vector<8x16xf32>
    %261 = vector.broadcast %258 : f32 to vector<8x16xf32>
    %262 = arith.mulf %261, %260 : vector<8x16xf32>
    %263 = arith.addf %257, %262 : vector<8x16xf32>
    %c3_213 = arith.constant 3 : index
    %c3_214 = arith.constant 3 : index
    %264 = memref.load %arg6[%c3_213, %c3_214] : memref<8x4xf32, #tpu.memory_space<smem>>
    %c3_215 = arith.constant 3 : index
    %c0_216 = arith.constant 0 : index
    %c0_217 = arith.constant 0 : index
    %265 = vector.load %arg8[%c3_215, %c0_216, %c0_217] : memref<4x8x16xf32, #tpu.memory_space<vmem>>, vector<1x8x16xf32>
    %266 = vector.shape_cast %265 : vector<1x8x16xf32> to vector<8x16xf32>
    %267 = vector.broadcast %264 : f32 to vector<8x16xf32>
    %268 = arith.mulf %267, %266 : vector<8x16xf32>
    %269 = arith.addf %263, %268 : vector<8x16xf32>
    %c0_218 = arith.constant 0 : index
    %c3_219 = arith.constant 3 : index
    %c0_220 = arith.constant 0 : index
    %c0_221 = arith.constant 0 : index
    %270 = vector.load %arg7[%c0_218, %c3_219, %c0_220, %c0_221] : memref<1x8x8x16xf32, #tpu.memory_space<vmem>>, vector<1x1x8x16xf32>
    %271 = vector.shape_cast %270 : vector<1x1x8x16xf32> to vector<8x16xf32>
    %272 = vector.shape_cast %269 : vector<8x16xf32> to vector<1x1x8x16xf32>
    tpu.vector_store %arg7[%c0_218, %c3_219, %c0_220, %c0_221], %272 {strides = array<i32>} : memref<1x8x8x16xf32, #tpu.memory_space<vmem>>, vector<1x1x8x16xf32>,
    %c4 = arith.constant 4 : index
    %c0_222 = arith.constant 0 : index
    %273 = memref.load %arg6[%c4, %c0_222] : memref<8x4xf32, #tpu.memory_space<smem>>
    %c0_223 = arith.constant 0 : index
    %c0_224 = arith.constant 0 : index
    %c0_225 = arith.constant 0 : index
    %274 = vector.load %arg8[%c0_223, %c0_224, %c0_225] : memref<4x8x16xf32, #tpu.memory_space<vmem>>, vector<1x8x16xf32>
    %275 = vector.shape_cast %274 : vector<1x8x16xf32> to vector<8x16xf32>
    %276 = vector.broadcast %273 : f32 to vector<8x16xf32>
    %277 = arith.mulf %276, %275 : vector<8x16xf32>
    %c4_226 = arith.constant 4 : index
    %c1_227 = arith.constant 1 : index
    %278 = memref.load %arg6[%c4_226, %c1_227] : memref<8x4xf32, #tpu.memory_space<smem>>
    %c1_228 = arith.constant 1 : index
    %c0_229 = arith.constant 0 : index
    %c0_230 = arith.constant 0 : index
    %279 = vector.load %arg8[%c1_228, %c0_229, %c0_230] : memref<4x8x16xf32, #tpu.memory_space<vmem>>, vector<1x8x16xf32>
    %280 = vector.shape_cast %279 : vector<1x8x16xf32> to vector<8x16xf32>
    %281 = vector.broadcast %278 : f32 to vector<8x16xf32>
    %282 = arith.mulf %281, %280 : vector<8x16xf32>
    %283 = arith.addf %277, %282 : vector<8x16xf32>
    %c4_231 = arith.constant 4 : index
    %c2_232 = arith.constant 2 : index
    %284 = memref.load %arg6[%c4_231, %c2_232] : memref<8x4xf32, #tpu.memory_space<smem>>
    %c2_233 = arith.constant 2 : index
    %c0_234 = arith.constant 0 : index
    %c0_235 = arith.constant 0 : index
    %285 = vector.load %arg8[%c2_233, %c0_234, %c0_235] : memref<4x8x16xf32, #tpu.memory_space<vmem>>, vector<1x8x16xf32>
    %286 = vector.shape_cast %285 : vector<1x8x16xf32> to vector<8x16xf32>
    %287 = vector.broadcast %284 : f32 to vector<8x16xf32>
    %288 = arith.mulf %287, %286 : vector<8x16xf32>
    %289 = arith.addf %283, %288 : vector<8x16xf32>
    %c4_236 = arith.constant 4 : index
    %c3_237 = arith.constant 3 : index
    %290 = memref.load %arg6[%c4_236, %c3_237] : memref<8x4xf32, #tpu.memory_space<smem>>
    %c3_238 = arith.constant 3 : index
    %c0_239 = arith.constant 0 : index
    %c0_240 = arith.constant 0 : index
    %291 = vector.load %arg8[%c3_238, %c0_239, %c0_240] : memref<4x8x16xf32, #tpu.memory_space<vmem>>, vector<1x8x16xf32>
    %292 = vector.shape_cast %291 : vector<1x8x16xf32> to vector<8x16xf32>
    %293 = vector.broadcast %290 : f32 to vector<8x16xf32>
    %294 = arith.mulf %293, %292 : vector<8x16xf32>
    %295 = arith.addf %289, %294 : vector<8x16xf32>
    %c0_241 = arith.constant 0 : index
    %c4_242 = arith.constant 4 : index
    %c0_243 = arith.constant 0 : index
    %c0_244 = arith.constant 0 : index
    %296 = vector.load %arg7[%c0_241, %c4_242, %c0_243, %c0_244] : memref<1x8x8x16xf32, #tpu.memory_space<vmem>>, vector<1x1x8x16xf32>
    %297 = vector.shape_cast %296 : vector<1x1x8x16xf32> to vector<8x16xf32>
    %298 = vector.shape_cast %295 : vector<8x16xf32> to vector<1x1x8x16xf32>
    tpu.vector_store %arg7[%c0_241, %c4_242, %c0_243, %c0_244], %298 {strides = array<i32>} : memref<1x8x8x16xf32, #tpu.memory_space<vmem>>, vector<1x1x8x16xf32>,
    %c5 = arith.constant 5 : index
    %c0_245 = arith.constant 0 : index
    %299 = memref.load %arg6[%c5, %c0_245] : memref<8x4xf32, #tpu.memory_space<smem>>
    %c0_246 = arith.constant 0 : index
    %c0_247 = arith.constant 0 : index
    %c0_248 = arith.constant 0 : index
    %300 = vector.load %arg8[%c0_246, %c0_247, %c0_248] : memref<4x8x16xf32, #tpu.memory_space<vmem>>, vector<1x8x16xf32>
    %301 = vector.shape_cast %300 : vector<1x8x16xf32> to vector<8x16xf32>
    %302 = vector.broadcast %299 : f32 to vector<8x16xf32>
    %303 = arith.mulf %302, %301 : vector<8x16xf32>
    %c5_249 = arith.constant 5 : index
    %c1_250 = arith.constant 1 : index
    %304 = memref.load %arg6[%c5_249, %c1_250] : memref<8x4xf32, #tpu.memory_space<smem>>
    %c1_251 = arith.constant 1 : index
    %c0_252 = arith.constant 0 : index
    %c0_253 = arith.constant 0 : index
    %305 = vector.load %arg8[%c1_251, %c0_252, %c0_253] : memref<4x8x16xf32, #tpu.memory_space<vmem>>, vector<1x8x16xf32>
    %306 = vector.shape_cast %305 : vector<1x8x16xf32> to vector<8x16xf32>
    %307 = vector.broadcast %304 : f32 to vector<8x16xf32>
    %308 = arith.mulf %307, %306 : vector<8x16xf32>
    %309 = arith.addf %303, %308 : vector<8x16xf32>
    %c5_254 = arith.constant 5 : index
    %c2_255 = arith.constant 2 : index
    %310 = memref.load %arg6[%c5_254, %c2_255] : memref<8x4xf32, #tpu.memory_space<smem>>
    %c2_256 = arith.constant 2 : index
    %c0_257 = arith.constant 0 : index
    %c0_258 = arith.constant 0 : index
    %311 = vector.load %arg8[%c2_256, %c0_257, %c0_258] : memref<4x8x16xf32, #tpu.memory_space<vmem>>, vector<1x8x16xf32>
    %312 = vector.shape_cast %311 : vector<1x8x16xf32> to vector<8x16xf32>
    %313 = vector.broadcast %310 : f32 to vector<8x16xf32>
    %314 = arith.mulf %313, %312 : vector<8x16xf32>
    %315 = arith.addf %309, %314 : vector<8x16xf32>
    %c5_259 = arith.constant 5 : index
    %c3_260 = arith.constant 3 : index
    %316 = memref.load %arg6[%c5_259, %c3_260] : memref<8x4xf32, #tpu.memory_space<smem>>
    %c3_261 = arith.constant 3 : index
    %c0_262 = arith.constant 0 : index
    %c0_263 = arith.constant 0 : index
    %317 = vector.load %arg8[%c3_261, %c0_262, %c0_263] : memref<4x8x16xf32, #tpu.memory_space<vmem>>, vector<1x8x16xf32>
    %318 = vector.shape_cast %317 : vector<1x8x16xf32> to vector<8x16xf32>
    %319 = vector.broadcast %316 : f32 to vector<8x16xf32>
    %320 = arith.mulf %319, %318 : vector<8x16xf32>
    %321 = arith.addf %315, %320 : vector<8x16xf32>
    %c0_264 = arith.constant 0 : index
    %c5_265 = arith.constant 5 : index
    %c0_266 = arith.constant 0 : index
    %c0_267 = arith.constant 0 : index
    %322 = vector.load %arg7[%c0_264, %c5_265, %c0_266, %c0_267] : memref<1x8x8x16xf32, #tpu.memory_space<vmem>>, vector<1x1x8x16xf32>
    %323 = vector.shape_cast %322 : vector<1x1x8x16xf32> to vector<8x16xf32>
    %324 = vector.shape_cast %321 : vector<8x16xf32> to vector<1x1x8x16xf32>
    tpu.vector_store %arg7[%c0_264, %c5_265, %c0_266, %c0_267], %324 {strides = array<i32>} : memref<1x8x8x16xf32, #tpu.memory_space<vmem>>, vector<1x1x8x16xf32>,
    %c6 = arith.constant 6 : index
    %c0_268 = arith.constant 0 : index
    %325 = memref.load %arg6[%c6, %c0_268] : memref<8x4xf32, #tpu.memory_space<smem>>
    %c0_269 = arith.constant 0 : index
    %c0_270 = arith.constant 0 : index
    %c0_271 = arith.constant 0 : index
    %326 = vector.load %arg8[%c0_269, %c0_270, %c0_271] : memref<4x8x16xf32, #tpu.memory_space<vmem>>, vector<1x8x16xf32>
    %327 = vector.shape_cast %326 : vector<1x8x16xf32> to vector<8x16xf32>
    %328 = vector.broadcast %325 : f32 to vector<8x16xf32>
    %329 = arith.mulf %328, %327 : vector<8x16xf32>
    %c6_272 = arith.constant 6 : index
    %c1_273 = arith.constant 1 : index
    %330 = memref.load %arg6[%c6_272, %c1_273] : memref<8x4xf32, #tpu.memory_space<smem>>
    %c1_274 = arith.constant 1 : index
    %c0_275 = arith.constant 0 : index
    %c0_276 = arith.constant 0 : index
    %331 = vector.load %arg8[%c1_274, %c0_275, %c0_276] : memref<4x8x16xf32, #tpu.memory_space<vmem>>, vector<1x8x16xf32>
    %332 = vector.shape_cast %331 : vector<1x8x16xf32> to vector<8x16xf32>
    %333 = vector.broadcast %330 : f32 to vector<8x16xf32>
    %334 = arith.mulf %333, %332 : vector<8x16xf32>
    %335 = arith.addf %329, %334 : vector<8x16xf32>
    %c6_277 = arith.constant 6 : index
    %c2_278 = arith.constant 2 : index
    %336 = memref.load %arg6[%c6_277, %c2_278] : memref<8x4xf32, #tpu.memory_space<smem>>
    %c2_279 = arith.constant 2 : index
    %c0_280 = arith.constant 0 : index
    %c0_281 = arith.constant 0 : index
    %337 = vector.load %arg8[%c2_279, %c0_280, %c0_281] : memref<4x8x16xf32, #tpu.memory_space<vmem>>, vector<1x8x16xf32>
    %338 = vector.shape_cast %337 : vector<1x8x16xf32> to vector<8x16xf32>
    %339 = vector.broadcast %336 : f32 to vector<8x16xf32>
    %340 = arith.mulf %339, %338 : vector<8x16xf32>
    %341 = arith.addf %335, %340 : vector<8x16xf32>
    %c6_282 = arith.constant 6 : index
    %c3_283 = arith.constant 3 : index
    %342 = memref.load %arg6[%c6_282, %c3_283] : memref<8x4xf32, #tpu.memory_space<smem>>
    %c3_284 = arith.constant 3 : index
    %c0_285 = arith.constant 0 : index
    %c0_286 = arith.constant 0 : index
    %343 = vector.load %arg8[%c3_284, %c0_285, %c0_286] : memref<4x8x16xf32, #tpu.memory_space<vmem>>, vector<1x8x16xf32>
    %344 = vector.shape_cast %343 : vector<1x8x16xf32> to vector<8x16xf32>
    %345 = vector.broadcast %342 : f32 to vector<8x16xf32>
    %346 = arith.mulf %345, %344 : vector<8x16xf32>
    %347 = arith.addf %341, %346 : vector<8x16xf32>
    %c0_287 = arith.constant 0 : index
    %c6_288 = arith.constant 6 : index
    %c0_289 = arith.constant 0 : index
    %c0_290 = arith.constant 0 : index
    %348 = vector.load %arg7[%c0_287, %c6_288, %c0_289, %c0_290] : memref<1x8x8x16xf32, #tpu.memory_space<vmem>>, vector<1x1x8x16xf32>
    %349 = vector.shape_cast %348 : vector<1x1x8x16xf32> to vector<8x16xf32>
    %350 = vector.shape_cast %347 : vector<8x16xf32> to vector<1x1x8x16xf32>
    tpu.vector_store %arg7[%c0_287, %c6_288, %c0_289, %c0_290], %350 {strides = array<i32>} : memref<1x8x8x16xf32, #tpu.memory_space<vmem>>, vector<1x1x8x16xf32>,
    %c7 = arith.constant 7 : index
    %c0_291 = arith.constant 0 : index
    %351 = memref.load %arg6[%c7, %c0_291] : memref<8x4xf32, #tpu.memory_space<smem>>
    %c0_292 = arith.constant 0 : index
    %c0_293 = arith.constant 0 : index
    %c0_294 = arith.constant 0 : index
    %352 = vector.load %arg8[%c0_292, %c0_293, %c0_294] : memref<4x8x16xf32, #tpu.memory_space<vmem>>, vector<1x8x16xf32>
    %353 = vector.shape_cast %352 : vector<1x8x16xf32> to vector<8x16xf32>
    %354 = vector.broadcast %351 : f32 to vector<8x16xf32>
    %355 = arith.mulf %354, %353 : vector<8x16xf32>
    %c7_295 = arith.constant 7 : index
    %c1_296 = arith.constant 1 : index
    %356 = memref.load %arg6[%c7_295, %c1_296] : memref<8x4xf32, #tpu.memory_space<smem>>
    %c1_297 = arith.constant 1 : index
    %c0_298 = arith.constant 0 : index
    %c0_299 = arith.constant 0 : index
    %357 = vector.load %arg8[%c1_297, %c0_298, %c0_299] : memref<4x8x16xf32, #tpu.memory_space<vmem>>, vector<1x8x16xf32>
    %358 = vector.shape_cast %357 : vector<1x8x16xf32> to vector<8x16xf32>
    %359 = vector.broadcast %356 : f32 to vector<8x16xf32>
    %360 = arith.mulf %359, %358 : vector<8x16xf32>
    %361 = arith.addf %355, %360 : vector<8x16xf32>
    %c7_300 = arith.constant 7 : index
    %c2_301 = arith.constant 2 : index
    %362 = memref.load %arg6[%c7_300, %c2_301] : memref<8x4xf32, #tpu.memory_space<smem>>
    %c2_302 = arith.constant 2 : index
    %c0_303 = arith.constant 0 : index
    %c0_304 = arith.constant 0 : index
    %363 = vector.load %arg8[%c2_302, %c0_303, %c0_304] : memref<4x8x16xf32, #tpu.memory_space<vmem>>, vector<1x8x16xf32>
    %364 = vector.shape_cast %363 : vector<1x8x16xf32> to vector<8x16xf32>
    %365 = vector.broadcast %362 : f32 to vector<8x16xf32>
    %366 = arith.mulf %365, %364 : vector<8x16xf32>
    %367 = arith.addf %361, %366 : vector<8x16xf32>
    %c7_305 = arith.constant 7 : index
    %c3_306 = arith.constant 3 : index
    %368 = memref.load %arg6[%c7_305, %c3_306] : memref<8x4xf32, #tpu.memory_space<smem>>
    %c3_307 = arith.constant 3 : index
    %c0_308 = arith.constant 0 : index
    %c0_309 = arith.constant 0 : index
    %369 = vector.load %arg8[%c3_307, %c0_308, %c0_309] : memref<4x8x16xf32, #tpu.memory_space<vmem>>, vector<1x8x16xf32>
    %370 = vector.shape_cast %369 : vector<1x8x16xf32> to vector<8x16xf32>
    %371 = vector.broadcast %368 : f32 to vector<8x16xf32>
    %372 = arith.mulf %371, %370 : vector<8x16xf32>
    %373 = arith.addf %367, %372 : vector<8x16xf32>
    %c0_310 = arith.constant 0 : index
    %c7_311 = arith.constant 7 : index
    %c0_312 = arith.constant 0 : index
    %c0_313 = arith.constant 0 : index
    %374 = vector.load %arg7[%c0_310, %c7_311, %c0_312, %c0_313] : memref<1x8x8x16xf32, #tpu.memory_space<vmem>>, vector<1x1x8x16xf32>
    %375 = vector.shape_cast %374 : vector<1x1x8x16xf32> to vector<8x16xf32>
    %376 = vector.shape_cast %373 : vector<8x16xf32> to vector<1x1x8x16xf32>
    tpu.vector_store %arg7[%c0_310, %c7_311, %c0_312, %c0_313], %376 {strides = array<i32>} : memref<1x8x8x16xf32, #tpu.memory_space<vmem>>, vector<1x1x8x16xf32>,
    return
  }
  func.func @transform_0(%arg0: i32, %arg1: i32) -> (i32, i32, i32, i32) {
    %c0_i32 = arith.constant 0 : i32
    %c0_i32_0 = arith.constant 0 : i32
    %c0_i32_1 = arith.constant 0 : i32
    return %arg0, %c0_i32, %arg1, %c0_i32_0 : i32, i32, i32, i32
  }
  func.func @transform_1(%arg0: i32, %arg1: i32) -> (i32, i32, i32, i32, i32) {
    %c0_i32 = arith.constant 0 : i32
    %c0_i32_0 = arith.constant 0 : i32
    %c0_i32_1 = arith.constant 0 : i32
    %c0_i32_2 = arith.constant 0 : i32
    return %arg0, %arg1, %c0_i32, %c0_i32_0, %c0_i32_1 : i32, i32, i32, i32, i32
  }
  func.func @transform_2(%arg0: i32, %arg1: i32) -> (i32, i32) {
    %c0_i32 = arith.constant 0 : i32
    %c0_i32_0 = arith.constant 0 : i32
    %c0_i32_1 = arith.constant 0 : i32
    return %c0_i32, %c0_i32_0 : i32, i32
  }
  func.func @transform_3(%arg0: i32, %arg1: i32) -> (i32, i32) {
    %c0_i32 = arith.constant 0 : i32
    %c0_i32_0 = arith.constant 0 : i32
    %c0_i32_1 = arith.constant 0 : i32
    return %c0_i32, %c0_i32_0 : i32, i32
  }
  func.func @transform_4(%arg0: i32, %arg1: i32) -> (i32, i32) {
    %c0_i32 = arith.constant 0 : i32
    %c0_i32_0 = arith.constant 0 : i32
    %c0_i32_1 = arith.constant 0 : i32
    return %c0_i32, %c0_i32_0 : i32, i32
  }
  func.func @transform_5(%arg0: i32, %arg1: i32) -> (i32, i32, i32, i32) {
    %c0_i32 = arith.constant 0 : i32
    %c0_i32_0 = arith.constant 0 : i32
    %c0_i32_1 = arith.constant 0 : i32
    return %arg0, %c0_i32, %arg1, %c0_i32_0 : i32, i32, i32, i32
  }
}

</mosaic_0001>

<bundles_post_ra>
// kernel: tpu_custom_call.1
= control target key start
LH: loop header
LB: loop body
LE: loop exit
PB: predicated region body
PF: predicated region fallthrough
CT: control target
= control target key end

     0   :  { %s1863_s0 = inlined_call_operand.hbm [shape: f32[2,4,16,16], index: 0, kind: input, shape index: {}]   ;;  %s1864_s1 = inlined_call_operand.hbm [shape: f32[2,2,4,2,16], index: 1, kind: input, shape index: {}]   ;;  %s1865_s2 = inlined_call_operand.vmem [shape: f32[3,4], index: 2, kind: input, shape index: {}]   ;;  %s1866_s3 = inlined_call_operand.vmem [shape: f32[3,4], index: 3, kind: input, shape index: {}]   ;;  %s1867_s4 = inlined_call_operand.vmem [shape: f32[8,4], index: 4, kind: input, shape index: {}]   ;;  %s1868_s5 = inlined_call_operand.hbm [shape: f32[2,8,16,16], index: 5, kind: output, shape index: {}]  }
   0x1   :  { %1891 = sst [smem:[#allocation36_spill]] %s1863_s0 }
   0x2   :  { %1892 = sst [smem:[#allocation37_spill]] %s1864_s1 }
   0x3   :  { %1893 = sst [smem:[#allocation38_spill]] %s1865_s2 }
   0x4   :  { %1894 = sst [smem:[#allocation39_spill]] %s1866_s3 }
   0x5   :  { %1895 = sst [smem:[#allocation40_spill]] %s1867_s4 }
   0x6   :  { %1896 = sst [smem:[#allocation41_spill]] %s1868_s5 }
   0x7   :  { %10 = vsyncpa [#allocation4], 0 }
   0x8   :  { %12 = vsyncpa [#allocation4 + $0x1], 0 }
   0x9   :  { %13 = vsyncpa [#allocation8], 0 }
   0xa   :  { %15 = vsyncpa [#allocation8 + $0x1], 0 }
   0xb   :  { %16 = vsyncpa [#allocation6], 0 }
   0xc   :  { %17 = vsyncpa [#allocation11], 0 }
   0xd   :  { %18 = vsyncpa [#allocation5], 0 }
   0xe   :  { %20 = vsyncpa [#allocation5 + $0x1], 0  ;;  %s1369_s18 = smov 0   ;;  %s1371_s19 = smov 0  }
   0xf   :  { %s1373_s20 = smov 0   ;;  %s1375_s21 = smov 0  }
  0x10   :  { %s1377_s22 = smov 0   ;;  %s1379_s23 = smov 0  }
  0x11   :  { %s1381_s24 = smov 0   ;;  %s1383_s25 = smov 0  }
  0x12 LB: > { %1897 = sst [smem:[#allocation19_spill]] %s1292_s18  ;;  %s891_s26 = sadd.s32 4294967295, %s1320_s25   ;;  %s1320_s25 = sphi %s1383_s25, %s26_s25   ;;  %s1316_s24 = sphi %s1381_s24, %s1951_s24   ;;  %s1312_s23 = sphi %s1379_s23, %s1950_s23   ;;  %s1308_s22 = sphi %s1377_s22, %s1949_s22   ;;  %s1304_s21 = sphi %s1375_s21, %s1948_s21   ;;  %s1300_s20 = sphi %s1373_s20, %s1947_s20   ;;  %s1296_s19 = sphi %s1371_s19, %s1946_s19   ;;  %s1292_s18 = sphi %s1369_s18, %s1945_s18  }
  0x13   : > { %1898 = sst [smem:[#allocation20_spill]] %s1296_s19  ;;  %s892_s27 = sadd.s32 4294967294, %s1320_s25  }
  0x14   : > { %1899 = sst [smem:[#allocation21_spill]] %s1300_s20  ;;  %p54_p0 = scmp.ne.s32.totalorder %s1300_s20, %s1296_s19 }
  0x15   : > { %1900 = sst [smem:[#allocation22_spill]] %s1304_s21  ;;  %p55_p1 = scmp.eq.s32.totalorder %s1320_s25, 0 }
  0x16   : > { %1901 = sst [smem:[#allocation23_spill]] %s1308_s22  ;;  %p60_p2 = scmp.ne.s32.totalorder %s1296_s19, %s1292_s18 }
  0x17   : > { %1902 = sst [smem:[#allocation24_spill]] %s1312_s23  ;;  %p1417_p3 = scmp.eq.s32.totalorder %s891_s26, 0 }
  0x18   : > { %1903 = sst [smem:[#allocation25_spill]] %s1316_s24  ;;  %p177_p4 = scmp.eq.s32.totalorder %s891_s26, 3 }
  0x19   : > { %1904 = sst [smem:[#allocation26_spill]] %s1320_s25  ;;  %p56_p5 = por %p55_p1, %p54_p0 }
  0x1a   : > { %s1905_s29 = scalar_select %p1417_p3, 1, 0 }
  0x1b   : > { %p183_p6 = scmp.eq.s32.totalorder %s892_s27, 3  ;;  %p1423_p7 = por %p1417_p3, %p60_p2 }
  0x1c   : > { %p1427_p8 = por %p177_p4, %p54_p0  ;;  %p893_p10 = scmp.ge.s32.totalorder %s1320_s25, 1 }
  0x1d   : > { %s1906_s30 = scalar_select %p1423_p7, 1, 0 }
  0x1e   : > { %s1907_s6 = scalar_select %p1427_p8, 1, 0 }
  0x1f   : > { %p1431_p9 = por %p183_p6, %p60_p2  ;;  %p190_p11 = scmp.lt.s32.totalorder %s1320_s25, 5 }
  0x20   : > { %1908 = sst [smem:[#allocation27_spill]] %s1907_s6  ;;  %p1028_p13 = scmp.lt.s32.totalorder %s1320_s25, 4 }
  0x21   : > { %s1909_s7 = scalar_select %p1431_p9, 1, 0 }
  0x22   : > { %s1911_s3 = sld [smem:[#allocation39_spill]]  ;;  %p1440_p12 = pnand %p893_p10, %p190_p11 }
  0x23   : > { %1910 = sst [smem:[#allocation28_spill]] %s1909_s7  ;;  %p1447_p1 = pnand %p1028_p13, %p56_p5 }
  0x24   : > { %s1912_s11 = scalar_select %p1440_p12, 1, 0 }
  0x25   : > { %p1004_p0 = pneg %p1440_p12  ;;  %s1915_s2 = sld [smem:[#allocation38_spill]] }
  0x26   : > { %s1913_s12 = scalar_select %p1447_p1, 1, 0 }
  0x27   : > { %p1453_p2 = pnand %p1004_p0, %p1417_p3 }
  0x28   : > { %s214_s10 = sshll.u32 %s1911_s3, 4  ;;  %s215_s10 = int_to_ptr.vmem [resolvable:$true] %s214_s10 }
  0x29   : > { %s1111_s17 = scalar_lea.vmem %s215_s10, 64  ;;  %p1113_p6 = pneg %p1453_p2 }
  0x2a   : > { %p1112_p4 = scmp.ne.s32.totalorder %s215_s10, %s1111_s17  ;;  %p1119_p11 = scmp.lt.s32.totalorder %s215_s10, %s215_s10 }
  0x2b   : > { %s203_s16 = sshll.u32 %s1915_s2, 4  ;;  %p1120_p13 = scmp.lt.s32.totalorder %s1111_s17, %s1111_s17  ;;  %s204_s16 = int_to_ptr.vmem [resolvable:$true] %s203_s16 }
  0x2c   : > { %p1114_p5 = pnand %p1113_p6, %p1112_p4 }
  0x2d   : > { %p1121_p0 = por %p1120_p13, %p1119_p11 }
  0x2e   : > { %p1115_p10 = pneg %p1114_p5 }
  0x30   : > { %p1122_p9 = pnand %p1121_p0, %p1115_p10 }
  0x32   : > { %1125 = shalt.err (!%p1122_p9)
}
  0x33   : > { %s1322_s26 = smov [#allocation10]   ;;  %s1126_s27 = scalar_lea.vmem %s204_s16, 64 }
  0x34   : > { %1010 = dma.vmem_to_smem (!%p1453_p2), %s215_s10, 64, %s1322_s26, [#allocation11]  }
  0x35   : > { %p1127_p8 = scmp.ne.s32.totalorder %s204_s16, %s1126_s27  ;;  %p1134_p12 = scmp.lt.s32.totalorder %s204_s16, %s204_s16 }
  0x36   : > { %p1135_p4 = scmp.lt.s32.totalorder %s1126_s27, %s1126_s27 }
  0x37   : > { %p1129_p3 = pnand %p1127_p8, %p1113_p6 }
  0x38   : > { %p1136_p5 = por %p1135_p4, %p1134_p12 }
  0x39   : > { %p1130_p7 = pneg %p1129_p3 }
  0x3b   : > { %p1137_p1 = pnand %p1136_p5, %p1130_p7 }
  0x3d   : > { %1140 = shalt.err (!%p1137_p1)
}
  0x3e   : > { %s1323_s8 = smov [#allocation9]   ;;  %s1916_s4 = sld [smem:[#allocation40_spill]] }
  0x3f   : > { %1007 = dma.vmem_to_smem (!%p1453_p2), %s204_s16, 64, %s1323_s8, [#allocation6]  }
  0x44   : > { %s225_s10 = sshll.u32 %s1916_s4, 4  ;;  %s226_s10 = int_to_ptr.vmem [resolvable:$true] %s225_s10 }
  0x45   : > { %s1141_s15 = scalar_lea.vmem %s226_s10, 128  ;;  %p1149_p10 = scmp.lt.s32.totalorder %s226_s10, %s226_s10 }
  0x46   : > { %p1142_p9 = scmp.ne.s32.totalorder %s226_s10, %s1141_s15  ;;  %p1150_p12 = scmp.lt.s32.totalorder %s1141_s15, %s1141_s15 }
  0x48   : > { %p1144_p3 = pnand %p1142_p9, %p1113_p6  ;;  %p1151_p7 = por %p1150_p12, %p1149_p10 }
  0x4a   : > { %p1145_p8 = pneg %p1144_p3 }
  0x4c   : > { %p1152_p1 = pnand %p1151_p7, %p1145_p8 }
  0x4e   : > { %1155 = shalt.err (!%p1152_p1)
}
  0x4f   : > { %s1324_s17 = smov [#allocation12]   ;;  %s35_s16 = sadd.s32 1, %s1312_s23 }
  0x50   : > { %1013 = dma.vmem_to_smem (!%p1453_p2), %s226_s10, 128, %s1324_s17, [#allocation11]  }
  0x51   : > { %p36_p6 = scmp.ge.s32.totalorder %s35_s16, 2  ;;  %s38_s26 = sadd.s32 1, %s1316_s24 }
  0x52   : > { %s1483_s27 = sand.u32 1, %s1300_s20   ;;  %s1880_s8 = sshll.u32 %s1316_s24, 3 }
  0x53   : > { %s1953_s16 = smov (%p36_p6, %s35_s16), 0  ;;  %s1955_s26 = smov (!%p36_p6, %s38_s26), %s1316_s24 }
  0x54   : > { %1917 = sst [smem:[#allocation29_spill]] %s1953_s16  ;;  %s43_s13 = ssub.s32 %s1312_s23, %s1953_s16 }
  0x55   : > { %p40_p11 = scmp.ge.s32.totalorder %s1955_s26, 2  ;;  %s898_s9 = sshll.u32 %s1483_s27, 5 }
  0x56   : > { %s245_s14 = sadd.s32 %s1312_s23, %s1880_s8  ;;  %s240_s15 = scalar_lea.vmem [#allocation3], %s898_s9 }
  0x57   : > { %s1957_s26 = smov (%p40_p11, %s1955_s26), 0  ;;  %s900_s10 = sshll.u32 %s245_s14, 7 }
  0x58   : > { %1918 = sst [smem:[#allocation30_spill]] %s1957_s26  ;;  %s248_s17 = sshll.u32 %s240_s15, 4  ;;  %s249_s17 = int_to_ptr.vmem [resolvable:$true] %s248_s17 }
  0x59   : > { %s42_s28 = ssub.s32 %s1316_s24, %s1957_s26  ;;  %s1919_s0 = sld [smem:[#allocation36_spill]] }
  0x5a   : > { %s44_s7 = sor.u32 %s43_s13, %s42_s28  ;;  %s1920_s16 = sadd.s32 1, %s1300_s20 }
  0x5b   : > { %p45_p2 = scmp.eq.s32.totalorder %s44_s7, 0  ;;  %s237_s25 = scalar_lea.sflag [#allocation4], %s1483_s27 }
  0x5c   : > { %p1922_p13 = scmp.ne.s32.totalorder %s1913_s12, 0  ;;  %s1169_s8 = scalar_lea.vmem %s249_s17, 512 }
  0x5d   : > { %s1505_s18 = scalar_select %p45_p2, %s1300_s20, %s1920_s16  }
  0x5e   : > { %p1158_p0 = pneg %p1922_p13  ;;  %p1170_p4 = scmp.ne.s32.totalorder %s249_s17, %s1169_s8 }
  0x5f   : > { %s247_s4 = scalar_lea.hbm %s1919_s0, %s900_s10  ;;  %1921 = sst [smem:[#allocation31_spill]] %s1505_s18 }
  0x60   : > { %p1172_p5 = pnand %p1170_p4, %p1158_p0  ;;  %s1325_s9 = smov [#allocation3]  }
  0x61   : > { %s1174_s14 = sshll.u32 %s1325_s9, 4  ;;  %s1175_s14 = int_to_ptr.vmem [resolvable:$false] %s1174_s14 }
  0x62   : > { %p1173_p9 = pneg %p1172_p5  ;;  %s1176_s2 = scalar_lea.vmem %s1175_s14, 1024 }
  0x63   : > { %p1177_p3 = scmp.lt.s32.totalorder %s249_s17, %s1175_s14  ;;  %p1178_p8 = scmp.lt.s32.totalorder %s1176_s2, %s1169_s8 }
  0x65   : > { %p1179_p10 = por %p1178_p8, %p1177_p3 }
  0x67   : > { %p1180_p12 = pnand %p1179_p10, %p1173_p9 }
  0x69   : > { %1183 = shalt.err (!%p1180_p12)
}
  0x6a   : > { %s1326_s3 = smov 256   ;;  %s1327_s28 = smov 128  }
  0x6b   : > { %s1328_s7 = smov 8   ;;  %s901_s16 = sshll.u32 %s1483_s27, 3 }
  0x6c   : > { %1017 = dma.hbm_to_vmem [thread:$0]  (!%p1922_p13), %s247_s4, 512, %s249_s17, %s237_s25, %s1326_s3, %s1327_s28, %s1328_s7  }
  0x6d   : > { %s902_s13 = sshll.u32 %s1312_s23, 2  ;;  %s1923_s10 = sshll.u32 %s1316_s24, 3 }
  0x6e   : > { %s268_s15 = sadd.s32 %s902_s13, %s1923_s10  ;;  %s262_s9 = scalar_lea.vmem [#allocation7], %s901_s16 }
  0x6f   : > { %s271_s8 = sshll.u32 %s262_s9, 4  ;;  %s904_s14 = sshll.u32 %s268_s15, 5  ;;  %s272_s8 = int_to_ptr.vmem [resolvable:$true] %s271_s8 }
  0x70   : > { %s1924_s1 = sld [smem:[#allocation37_spill]]  ;;  %s259_s18 = scalar_lea.sflag [#allocation8], %s1483_s27 }
  0x71   : > { %s1197_s20 = scalar_lea.vmem %s272_s8, 128  ;;  %s1329_s4 = smov [#allocation7]  }
  0x72   : > { %p1198_p7 = scmp.ne.s32.totalorder %s272_s8, %s1197_s20  ;;  %s1202_s25 = sshll.u32 %s1329_s4, 4  ;;  %s1203_s25 = int_to_ptr.vmem [resolvable:$false] %s1202_s25 }
  0x73   : > { %s1204_s17 = scalar_lea.vmem %s1203_s25, 256  ;;  %p1205_p11 = scmp.lt.s32.totalorder %s272_s8, %s1203_s25 }
  0x74   : > { %p1200_p1 = pnand %p1198_p7, %p1158_p0  ;;  %p1206_p2 = scmp.lt.s32.totalorder %s1204_s17, %s1197_s20 }
  0x76   : > { %s270_s26 = scalar_lea.hbm %s1924_s1, %s904_s14  ;;  %p1201_p6 = pneg %p1200_p1 }
  0x77   : > { %p1207_p4 = por %p1206_p2, %p1205_p11 }
  0x79   : > { %p1208_p5 = pnand %p1207_p4, %p1201_p6 }
  0x7b   : > { %1211 = shalt.err (!%p1208_p5)
}
  0x7c   : > { %s1330_s3 = smov 32   ;;  %s1331_s0 = smov 2  }
  0x7d   : > { %1020 = dma.hbm_to_vmem [thread:$0]  (!%p1922_p13), %s270_s26, 128, %s272_s8, %s259_s18, %s1330_s3, %s1330_s3, %s1331_s0  }
  0x7e   : > { %p1925_p9 = scmp.ne.s32.totalorder %s1912_s11, 0 }
  0x80   : > { %283 = sbr.rel (%p1925_p9) target bundleno = 559 (0x22f), region = 40 }
  0x85   : > { %s1531_s27 = sand.u32 1, %s1296_s19   ;;  %p1927_p0 = scmp.ne.s32.totalorder %s1906_s30, 0 }
  0x86   : > { %1926 = sst [smem:[#allocation32_spill]] %s1531_s27  ;;  %s906_s28 = sshll.u32 %s1531_s27, 5 }
  0x87   : > { %s286_s7 = scalar_lea.sflag [#allocation4], %s1531_s27  ;;  %s1535_s20 = scalar_lea.vmem [#allocation3], %s906_s28 }
  0x88   : > { %1271 = dma.done.wait (%p1927_p0), %s286_s7, 512  }
  0x89   : > { %1273 = vsyncadd (%p1927_p0), %s286_s7, 4294966784  ;;  %s907_s18 = sshll.u32 %s1531_s27, 3  ;;  %s295_s11 = scalar_lea.sflag [#allocation8], %s1531_s27 }
  0x8a   : > { %s1543_s12 = scalar_lea.vmem [#allocation7], %s907_s18 }
  0x8b   : > { %1275 = dma.done.wait (%p1927_p0), %s295_s11, 128  }
  0x8c   : > { %1277 = vsyncadd (%p1927_p0), %s295_s11, 4294967168  ;;  %p1928_p13 = scmp.ne.s32.totalorder %s1905_s29, 0 }
  0x8e   : > { %1279 = dma.done.wait (%p1928_p13), [#allocation6], 64  }
  0x8f   : > { %1281 = vsyncadd (%p1928_p13), [#allocation6], 4294967232 }
  0x90   : > { %1283 = dma.done.wait (%p1928_p13), [#allocation11], 192  }
  0x91   : > { %1285 = vsyncadd (%p1928_p13), [#allocation11], 4294967104 }
  0x92   : > { %315 = sfence }
  0x93   : > { %v347_v0 = vld [vmem:[%s1535_s20] sm:$0xff]  ;;  %s362_s30 = sld [smem:[#allocation9]]  ;;  %vm353_vm0 = vcmask 1040384   ;;  %v916_v4 = vld [vmem:[%s1535_s20 + $0x8] sm:$0xff]  ;;  %vm360_vm1 = vcmask 1046528   ;;  %v925_v9 = vld [vmem:[%s1535_s20 + $0x10] sm:$0xff] }
  0x94   : > { %v349_v1 = vld [vmem:[%s1543_s12 + $0x1] sm:$0x1]  ;;  %v351_v2 = vrot.slane %v347_v0, 7  ;;  %v348_v3 = vld [vmem:[%s1543_s12] sm:$0x1]  ;;  %s912_s26 = sld [smem:[#allocation9 + $0x80]] }
  0x95   : > { %v355_v5 = vrot.slane %v347_v0, 1  ;;  %v358_v6 = vrot.slane %v349_v1, 1  ;;  %s913_s29 = sld [smem:[#allocation9 + $0x100]]  ;;  %v918_v7 = vld [vmem:[%s1543_s12 + $0x3] sm:$0x1]  ;;  %v408_v8 = vrot.slane %v916_v4, 7 }
  0x96   : > { %s1562_s16 = sld [smem:[#allocation9 + $0x1]]  ;;  %v354_v10 = vsel %vm353_vm0, %v348_v3, %v351_v2  ;;  %v917_v11 = vld [vmem:[%s1543_s12 + $0x2] sm:$0x1]  ;;  %v411_v12 = vrot.slane %v916_v4, 1  ;;  %v414_v13 = vrot.slane %v918_v7, 1  ;;  %v462_v17 = vrot.slane %v925_v9, 7 }
  0x97   : > { %s1567_s13 = sld [smem:[#allocation9 + $0x81]]  ;;  %v927_v14 = vld [vmem:[%s1543_s12 + $0x5] sm:$0x1]  ;;  %v361_v15 = vsel %vm360_vm1, %v355_v5, %v358_v6  ;;  %v934_v18 = vld [vmem:[%s1535_s20 + $0x18] sm:$0xff]  ;;  %v410_v21 = vsel %vm353_vm0, %v917_v11, %v408_v8  ;;  %v926_v22 = vld [vmem:[%s1543_s12 + $0x4] sm:$0x1] }
  0x98   : > { %s1569_s10 = sld [smem:[#allocation9 + $0x101]]  ;;  %v465_v25 = vrot.slane %v925_v9, 1  ;;  %v468_v26 = vrot.slane %v927_v14, 1  ;;  %v936_v27 = vld [vmem:[%s1543_s12 + $0x7] sm:$0x1]  ;;  %v416_v29 = vsel %vm360_vm1, %v411_v12, %v414_v13  ;;  %v516_v31 = vrot.slane %v934_v18, 7 }
  0x99   : > { %v363_v16 = vstv %s362_s30  ;;  %s1573_s15 = sld [smem:[#allocation9 + $0x2]]  ;;  %v464_v35 = vsel %vm353_vm0, %v926_v22, %v462_v17  ;;  %v935_v36 = vld [vmem:[%s1543_s12 + $0x6] sm:$0x1]  ;;  %v519_v39 = vrot.slane %v934_v18, 1  ;;  %v522_v40 = vrot.slane %v936_v27, 1  ;;  %s1332_s25 = smov 16  }
  0x9a   : > { %v364_v19 = vmul.f32 %v363_v16, %v354_v10  ;;  %v366_v20 = vstv %s912_s26  ;;  %s1578_s9 = sld [smem:[#allocation9 + $0x82]]  ;;  %v470_v43 = vsel %vm360_vm1, %v465_v25, %v468_v26  ;;  %v518_v48 = vsel %vm353_vm0, %v935_v36, %v516_v31  ;;  %s1333_s17 = smov 113  }
  0x9b   : > { %v367_v23 = vmul.f32 %v366_v20, %v347_v0  ;;  %v370_v24 = vstv %s913_s29  ;;  %s1580_s8 = sld [smem:[#allocation9 + $0x102]]  ;;  %v524_v53 = vsel %vm360_vm1, %v519_v39, %v522_v40  ;;  %vm373_vm2 = vcmask 1047680   ;;  %s1334_s3 = smov 127  }
  0x9c   : > { %v371_v28 = vmul.f32 %v370_v24, %v361_v15  ;;  %v418_v30 = vstv %s1562_s16  ;;  %s937_s14 = sld [smem:[#allocation9 + $0x3]]  ;;  %v343_v16 = vlaneseq  ;;  %vm400_vm5 = vcmask 130048  }
  0x9d   : > { %v368_v32 = vadd.f32 %v367_v23, %v364_v19  ;;  %v419_v33 = vmul.f32 %v418_v30, %v410_v21  ;;  %v421_v34 = vstv %s1567_s13  ;;  %s938_s2 = sld [smem:[#allocation9 + $0x83]] }
  0x9e   : > { %v422_v37 = vmul.f32 %v916_v4, %v421_v34  ;;  %v425_v38 = vstv %s1569_s10  ;;  %s939_s4 = sld [smem:[#allocation9 + $0x103]]  ;;  %v1663_v17 = vand.u32 127, %v343_v16 }
  0x9f   : > { %v1589_v41 = vadd.f32 %v371_v28, %v368_v32  ;;  %v426_v42 = vmul.f32 %v425_v38, %v416_v29  ;;  %v472_v44 = vstv %s1573_s15  ;;  %s1631_s0 = sld [smem:[#allocation10]] }
  0xa0   : > { %v423_v45 = vadd.f32 %v422_v37, %v419_v33  ;;  %v473_v46 = vmul.f32 %v472_v44, %v464_v35  ;;  %v475_v47 = vstv %s1578_s9  ;;  %s1633_s28 = sld [smem:[#allocation10 + $0x80]]  ;;  %vm345_vm3 = vcmp.ne.s32.totalorder %v1663_v17, 0 }
  0xa1   : > { %374 = vrot.lane.b32.xlu0 %v1589_v41, %s1332_s25  ;;  %v476_v49 = vmul.f32 %v925_v9, %v475_v47  ;;  %v479_v50 = vstv %s1580_s8  ;;  %s1635_s7 = sld [smem:[#allocation10 + $0x1]]  ;;  %vm346_vm4 = vcmp.ne.s32.totalorder %v1663_v17, 15 }
  0xa2   : > { %v1598_v51 = vadd.f32 %v426_v42, %v423_v45  ;;  %v480_v52 = vmul.f32 %v479_v50, %v470_v43  ;;  %v526_v54 = vstv %s937_s14  ;;  %s1637_s20 = sld [smem:[#allocation10 + $0x81]] }
  0xa3   : > { %v477_v55 = vadd.f32 %v476_v49, %v473_v46  ;;  %v527_v56 = vmul.f32 %v526_v54, %v518_v48  ;;  %v529_v57 = vstv %s938_s2  ;;  %s1639_s18 = sld [smem:[#allocation10 + $0x100]] }
  0xa4   : > { %v530_v58 = vmul.f32 %v934_v18, %v529_v57  ;;  %v533_v59 = vstv %s939_s4  ;;  %s1641_s11 = sld [smem:[#allocation10 + $0x101]] }
  0xa5   : > { %428 = vrot.lane.b32.xlu0 %v1598_v51, %s1332_s25  ;;  %v1603_v60 = vadd.f32 %v480_v52, %v477_v55  ;;  %v534_v61 = vmul.f32 %v533_v59, %v524_v53  ;;  %s1643_s12 = sld [smem:[#allocation10 + $0x2]]  ;;  %v386_v18 = vstv %s1631_s0 }
  0xa6   : > { %v531_v62 = vadd.f32 %v530_v58, %v527_v56  ;;  %s1645_s30 = sld [smem:[#allocation10 + $0x82]]  ;;  %v389_v19 = vstv %s1633_s28 }
  0xa7   : > { %482 = vrot.lane.b32.xlu1 %v1603_v60, %s1332_s25  ;;  %s1647_s26 = sld [smem:[#allocation12]]  ;;  %v390_v23 = vmul.f32 %v389_v19, %v1589_v41  ;;  %v440_v24 = vstv %s1635_s7 }
  0xa8   : > { %v1607_v63 = vadd.f32 %v534_v61, %v531_v62  ;;  %s1649_s29 = sld [smem:[#allocation12 + $0x80]]  ;;  %v443_v25 = vstv %s1637_s20 }
  0xa9   : > { %s1651_s16 = sld [smem:[#allocation12 + $0x100]]  ;;  %v397_v26 = vstv %s1639_s18  ;;  %v444_v33 = vmul.f32 %v443_v25, %v1598_v51 }
  0xaa   : > { %s1653_s13 = sld [smem:[#allocation12 + $0x180]]  ;;  %v451_v36 = vstv %s1641_s11 }
  0xab   : > { %536 = vrot.lane.b32.xlu1 %v1607_v63, %s1332_s25  ;;  %s1655_s10 = sld [smem:[#allocation12 + $0x200]]  ;;  %v494_v37 = vstv %s1643_s12 }
  0xac   : > { %s1657_s15 = sld [smem:[#allocation12 + $0x280]]  ;;  %v497_v31 = vstv %s1645_s30 }
  0xad   : > { %s1659_s9 = sld [smem:[#allocation12 + $0x300]]  ;;  %v498_v40 = vmul.f32 %v497_v31, %v1603_v60  ;;  %v566_v58 = vstv %s1647_s26 }
  0xae   : > { %s1661_s8 = sld [smem:[#allocation12 + $0x380]]  ;;  %v586_v59 = vstv %s1649_s29 }
  0xaf   : > { %s1665_s14 = sld [smem:[#allocation12 + $0x1]] }
  0xb0   : > { %s1667_s2 = sld [smem:[#allocation12 + $0x81]]  ;;  %v628_v62 = vstv %s1653_s13 }
  0xb1   : > { %s1669_s4 = sld [smem:[#allocation12 + $0x101]] }
  0xb2   : > { %s1680_s1 = sld [smem:[#allocation12 + $0x301]] }
  0xb3   : > { %s1684_s24 = sld [smem:[#allocation12 + $0x381]] }
  0xb4   : > { %s1688_s23 = sld [smem:[#allocation10 + $0x102]] }
  0xb5   : > { %s1693_s0 = sld [smem:[#allocation12 + $0x2]] }
  0xb6   : > { %s1695_s28 = sld [smem:[#allocation12 + $0x82]] }
  0xb7   : > { %s1702_s19 = sld [smem:[#allocation12 + $0x102]] }
  0xb8   : > { %s1705_s7 = sld [smem:[#allocation12 + $0x182]] }
  0xb9   : > { %s1709_s20 = sld [smem:[#allocation12 + $0x202]] }
  0xba   : > { %s1712_s18 = sld [smem:[#allocation12 + $0x282]]  ;;  %v505_v47 = vstv %s1688_s23 }
  0xbb   : > { %s1718_s30 = sld [smem:[#allocation12 + $0x302]] }
  0xbc   : > { %s1721_s11 = sld [smem:[#allocation10 + $0x3]]  ;;  %v595_v16 = vstv %s1695_s28 }
  0xbd   : > { %s1724_s12 = sld [smem:[#allocation10 + $0x83]] }
  0xbe   : > { %s1726_s6 = sld [smem:[#allocation12 + $0x382]]  ;;  %v637_v17 = vstv %s1705_s7 }
  0xbf   : > { %s1730_s5 = sld [smem:[#allocation10 + $0x103]] }
  0xc0   : > { %s1733_s23 = sld [smem:[#allocation12 + $0x3]] }
  0xc1   : > { %s1735_s21 = sld [smem:[#allocation12 + $0x83]] }
  0xc2   : > { %s1737_s27 = sld [smem:[#allocation12 + $0x103]]  ;;  %v548_v55 = vstv %s1721_s11 }
  0xc3   : > { %s1739_s22 = sld [smem:[#allocation12 + $0x183]]  ;;  %v551_v56 = vstv %s1724_s12 }
  0xc4   : > { %1929 = sst [smem:[#allocation33_spill]] %s1726_s6 }
  0xc5   : > { %s1742_s6 = sld [smem:[#allocation12 + $0x203]] }
  0xc6   : > { %s1759_s11 = sld [smem:[#allocation12 + $0x383]] }
  0xc7   : > { %1930 = sst [smem:[#allocation34_spill]] %s1735_s21 }
  0xc8   : > { %s1748_s21 = sld [smem:[#allocation12 + $0x283]] }
  0xc9   : > { %1931 = sst [smem:[#allocation35_spill]] %s1739_s22 }
  0xca   : > { %s1753_s22 = sld [smem:[#allocation12 + $0x303]] }
  0xcb   : > { %s1932_s26 = sld [smem:[#allocation33_spill]] }
  0xcc   : > { %s1933_s29 = sld [smem:[#allocation34_spill]] }
  0xd1   : > { %v721_v25 = vstv %s1932_s26 }
 0x113   : > { %v375_v0 = vpop.permute.xlu0 %374 }
 0x114   : > { %v376_v1 = vsel %vm373_vm2, %v375_v0, %v1589_v41  ;;  %v649_v0 = vstv %s1655_s10 }
 0x115   : > { %377 = vrot.lane.b32.xlu0 %v376_v1, %s1332_s25  ;;  %v670_v1 = vstv %s1657_s15 }
 0x117   : > { %v429_v2 = vpop.permute.xlu0 %428 }
 0x118   : > { %v430_v3 = vsel %vm373_vm2, %v429_v2, %v1598_v51  ;;  %v691_v2 = vstv %s1659_s9  ;;  %s1938_s9 = sld [smem:[#allocation41_spill]] }
 0x119   : > { %431 = vrot.lane.b32.xlu1 %v430_v3, %s1332_s25  ;;  %v483_v4 = vpop.permute.xlu1 %482  ;;  %v712_v3 = vstv %s1661_s8 }
 0x11a   : > { %v484_v5 = vsel %vm373_vm2, %v483_v4, %v1603_v60  ;;  %v570_v4 = vstv %s1665_s14  ;;  %s1939_s14 = sld [smem:[#allocation27_spill]] }
 0x11b   : > { %485 = vrot.lane.b32.xlu0 %v484_v5, %s1332_s25  ;;  %v552_v5 = vmul.f32 %v551_v56, %v1607_v63 }
 0x11d   : > { %v537_v6 = vpop.permute.xlu1 %536 }
 0x11e   : > { %v538_v7 = vsel %vm373_vm2, %v537_v6, %v1607_v63 }
 0x11f   : > { %539 = vrot.lane.b32.xlu1 %v538_v7, %s1332_s25  ;;  %s1671_s25 = sld [smem:[#allocation12 + $0x181]]  ;;  %v590_v7 = vstv %s1667_s2 }
 0x120   : > { %p1940_p8 = scmp.ne.s32.totalorder %s1939_s14, 0 }
 0x187   : > { %v378_v8 = vpop.permute.xlu0 %377 }
 0x188   : > { %v379_v9 = vsel %vm373_vm2, %v378_v8, %v1589_v41  ;;  %v611_v8 = vstv %s1669_s4 }
 0x189   : > { %382 = vrot.lane.b32.xlu0 %v379_v9, %s1333_s17 }
 0x18b   : > { %v432_v10 = vpop.permute.xlu1 %431 }
 0x18c   : > { %v433_v11 = vsel %vm373_vm2, %v432_v10, %v1598_v51 }
 0x18d   : > { %436 = vrot.lane.b32.xlu1 %v433_v11, %s1333_s17  ;;  %393 = vrot.lane.b32.xlu0 %v379_v9, %s1334_s3  ;;  %v486_v12 = vpop.permute.xlu0 %485  ;;  %v559_v9 = vstv %s1730_s5  ;;  %s1936_s5 = sld [smem:[#allocation32_spill]] }
 0x18e   : > { %v487_v13 = vsel %vm373_vm2, %v486_v12, %v1603_v60  ;;  %v607_v60 = vstv %s1651_s16  ;;  %s1934_s16 = sld [smem:[#allocation35_spill]] }
 0x191   : > { %447 = vrot.lane.b32.xlu1 %v433_v11, %s1334_s3  ;;  %490 = vrot.lane.b32.xlu0 %v487_v13, %s1333_s17  ;;  %v540_v14 = vpop.permute.xlu1 %539  ;;  %v632_v11 = vstv %s1671_s25  ;;  %s1335_s25 = smov [#allocation13]  }
 0x192   : > { %v541_v15 = vsel %vm373_vm2, %v540_v14, %v1607_v63  ;;  %v695_v14 = vstv %s1680_s1  ;;  %v716_v63 = vstv %s1684_s24  ;;  %s1935_s1 = sld [smem:[#allocation23_spill]] }
 0x193   : > { %s732_s2 = scalar_lea.sflag [#allocation5], %s1936_s5 }
 0x195   : > { %501 = vrot.lane.b32.xlu1 %v487_v13, %s1334_s3  ;;  %544 = vrot.lane.b32.xlu0 %v541_v15, %s1333_s17  ;;  %s1674_s17 = sld [smem:[#allocation12 + $0x201]] }
 0x199   : > { %555 = vrot.lane.b32.xlu1 %v541_v15, %s1334_s3  ;;  %s1678_s3 = sld [smem:[#allocation12 + $0x281]]  ;;  %v575_v15 = vstv %s1693_s0 }
 0x19b   : > { %v653_v12 = vstv %s1674_s17  ;;  %s1216_s17 = sshll.u32 %s1335_s25, 4  ;;  %s1217_s17 = int_to_ptr.vmem [resolvable:$false] %s1216_s17 }
 0x19f   : > { %v674_v13 = vstv %s1678_s3  ;;  %s1218_s3 = scalar_lea.vmem %s1217_s17, 2048 }
 0x1fb   : > { %v383_v20 = vpop.permute.xlu0 %382 }
 0x1fc   : > { %v385_v21 = vsel %vm345_vm3, %v383_v20, 0.0  ;;  %v658_v20 = vstv %s1709_s20 }
 0x1fd   : > { %v387_v22 = vmul.f32 %v386_v18, %v385_v21  ;;  %v616_v18 = vstv %s1702_s19  ;;  %s1937_s19 = sld [smem:[#allocation22_spill]] }
 0x1ff   : > { %v437_v27 = vpop.permute.xlu1 %436  ;;  %v394_v28 = vpop.permute.xlu0 %393  ;;  %v391_v32 = vadd.f32 %v390_v23, %v387_v22  ;;  %v679_v23 = vstv %s1712_s18 }
 0x200   : > { %v439_v29 = vsel %vm345_vm3, %v437_v27, 0.0  ;;  %v396_v30 = vsel %vm346_vm4, %v394_v28, 0.0  ;;  %v600_v27 = vstv %s1933_s29  ;;  %v621_v28 = vstv %s1737_s27 }
 0x201   : > { %v441_v34 = vmul.f32 %v440_v24, %v439_v29  ;;  %v398_v35 = vmul.f32 %v397_v26, %v396_v30  ;;  %v700_v24 = vstv %s1718_s30  ;;  %v580_v26 = vstv %s1733_s23 }
 0x202   : > { %v642_v29 = vstv %s1934_s16  ;;  %v663_v30 = vstv %s1742_s6 }
 0x203   : > { %v399_v38 = vadd.f32 %v398_v35, %v391_v32  ;;  %v448_v39 = vpop.permute.xlu1 %447  ;;  %v491_v41 = vpop.permute.xlu0 %490  ;;  %v445_v44 = vadd.f32 %v444_v33, %v441_v34  ;;  %v684_v33 = vstv %s1748_s21  ;;  %v705_v34 = vstv %s1753_s22  ;;  %s982_s21 = sshll.u32 %s1935_s1, 4  ;;  %s911_s22 = sshll.u32 %s1936_s5, 6 }
 0x204   : > { %v450_v42 = vsel %vm346_vm4, %v448_v39, 0.0  ;;  %v493_v43 = vsel %vm345_vm3, %v491_v41, 0.0  ;;  %v726_v35 = vstv %s1759_s11  ;;  %s1794_s24 = sadd.s32 %s1937_s19, %s982_s21  ;;  %s342_s27 = scalar_lea.vmem [#allocation13], %s911_s22 }
 0x205   : > { %401 = vst.msk [vmem:[#allocation2] sm:$0xff] %vm400_vm5, %v399_v38  ;;  %v452_v45 = vmul.f32 %v451_v36, %v450_v42  ;;  %v495_v46 = vmul.f32 %v494_v37, %v493_v43  ;;  %s983_s6 = sshll.u32 %s1794_s24, 7  ;;  %s746_s13 = sshll.u32 %s342_s27, 4  ;;  %s1802_s13 = int_to_ptr.vmem [resolvable:$true] %s746_s13 }
 0x206   : > { %s1800_s8 = scalar_lea.hbm %s1938_s9, %s983_s6  ;;  %s1212_s4 = scalar_lea.vmem %s1802_s13, 1024 }
 0x207   : > { %v453_v48 = vadd.f32 %v452_v45, %v445_v44  ;;  %v499_v49 = vadd.f32 %v498_v40, %v495_v46  ;;  %v502_v50 = vpop.permute.xlu1 %501  ;;  %v545_v54 = vpop.permute.xlu0 %544  ;;  %p1213_p3 = scmp.ne.s32.totalorder %s1802_s13, %s1212_s4  ;;  %p1219_p7 = scmp.lt.s32.totalorder %s1802_s13, %s1217_s17 }
 0x208   : > { %v504_v51 = vsel %vm346_vm4, %v502_v50, 0.0  ;;  %v547_v57 = vsel %vm345_vm3, %v545_v54, 0.0  ;;  %p1220_p1 = scmp.lt.s32.totalorder %s1218_s3, %s1212_s4 }
 0x209   : > { %455 = vst.msk [vmem:[#allocation2 + $0x8] sm:$0xff] %vm400_vm5, %v453_v48  ;;  %v506_v52 = vmul.f32 %v505_v47, %v504_v51  ;;  %v549_v6 = vmul.f32 %v548_v55, %v547_v57  ;;  %p1214_p10 = pnand %p1213_p3, %p1940_p8 }
 0x20a   : > { %p1221_p6 = por %p1220_p1, %p1219_p7 }
 0x20b   : > { %v507_v53 = vadd.f32 %v506_v52, %v499_v49  ;;  %v556_v61 = vpop.permute.xlu1 %555  ;;  %v553_v21 = vadd.f32 %v552_v5, %v549_v6  ;;  %p1215_p12 = pneg %p1214_p10 }
 0x20c   : > { %v558_v10 = vsel %vm346_vm4, %v556_v61, 0.0  ;;  %v565_v19 = vld [vmem:[#allocation2] sm:$0xff] }
 0x20d   : > { %509 = vst.msk [vmem:[#allocation2 + $0x10] sm:$0xff] %vm400_vm5, %v507_v53  ;;  %v560_v22 = vmul.f32 %v559_v9, %v558_v10  ;;  %v567_v31 = vmul.f32 %v566_v58, %v565_v19  ;;  %v587_v36 = vmul.f32 %v586_v59, %v565_v19  ;;  %v608_v37 = vmul.f32 %v607_v60, %v565_v19  ;;  %p1222_p11 = pnand %p1221_p6, %p1215_p12 }
 0x20e   : > { %v629_v38 = vmul.f32 %v628_v62, %v565_v19  ;;  %v650_v40 = vmul.f32 %v649_v0, %v565_v19  ;;  %v671_v41 = vmul.f32 %v670_v1, %v565_v19  ;;  %v692_v42 = vmul.f32 %v691_v2, %v565_v19 }
 0x20f   : > { %v561_v39 = vadd.f32 %v560_v22, %v553_v21  ;;  %v713_v43 = vmul.f32 %v712_v3, %v565_v19 }
 0x210   : > { %v569_v32 = vld [vmem:[#allocation2 + $0x8] sm:$0xff] }
 0x211   : > { %v571_v45 = vmul.f32 %v570_v4, %v569_v32  ;;  %v591_v46 = vmul.f32 %v590_v7, %v569_v32  ;;  %v612_v47 = vmul.f32 %v611_v8, %v569_v32  ;;  %v633_v48 = vmul.f32 %v632_v11, %v569_v32  ;;  %563 = vst.msk [vmem:[#allocation2 + $0x18] sm:$0xff] %vm400_vm5, %v561_v39 }
 0x212   : > { %v654_v49 = vmul.f32 %v653_v12, %v569_v32  ;;  %v675_v50 = vmul.f32 %v674_v13, %v569_v32  ;;  %v696_v51 = vmul.f32 %v695_v14, %v569_v32  ;;  %v717_v52 = vmul.f32 %v716_v63, %v569_v32 }
 0x213   : > { %v572_v61 = vadd.f32 %v571_v45, %v567_v31  ;;  %v592_v62 = vadd.f32 %v591_v46, %v587_v36  ;;  %v613_v0 = vadd.f32 %v612_v47, %v608_v37  ;;  %v634_v1 = vadd.f32 %v633_v48, %v629_v38 }
 0x214   : > { %v574_v44 = vld [vmem:[#allocation2 + $0x10] sm:$0xff]  ;;  %v655_v2 = vadd.f32 %v654_v49, %v650_v40  ;;  %v676_v3 = vadd.f32 %v675_v50, %v671_v41  ;;  %v697_v4 = vadd.f32 %v696_v51, %v692_v42  ;;  %v718_v5 = vadd.f32 %v717_v52, %v713_v43 }
 0x215   : > { %v576_v53 = vmul.f32 %v575_v15, %v574_v44  ;;  %v596_v54 = vmul.f32 %v595_v16, %v574_v44  ;;  %v617_v55 = vmul.f32 %v616_v18, %v574_v44  ;;  %v638_v56 = vmul.f32 %v637_v17, %v574_v44 }
 0x216   : > { %v659_v57 = vmul.f32 %v658_v20, %v574_v44  ;;  %v680_v58 = vmul.f32 %v679_v23, %v574_v44  ;;  %v701_v59 = vmul.f32 %v700_v24, %v574_v44  ;;  %v722_v60 = vmul.f32 %v721_v25, %v574_v44 }
 0x217   : > { %v577_v6 = vadd.f32 %v576_v53, %v572_v61  ;;  %v597_v7 = vadd.f32 %v596_v54, %v592_v62  ;;  %v618_v8 = vadd.f32 %v617_v55, %v613_v0  ;;  %v639_v9 = vadd.f32 %v638_v56, %v634_v1 }
 0x218   : > { %v660_v10 = vadd.f32 %v659_v57, %v655_v2  ;;  %v681_v11 = vadd.f32 %v680_v58, %v676_v3  ;;  %v702_v12 = vadd.f32 %v701_v59, %v697_v4  ;;  %v723_v13 = vadd.f32 %v722_v60, %v718_v5  ;;  %v579_v14 = vld [vmem:[#allocation2 + $0x18] sm:$0xff] }
 0x219   : > { %v581_v63 = vmul.f32 %v580_v26, %v579_v14  ;;  %v601_v15 = vmul.f32 %v600_v27, %v579_v14  ;;  %v622_v16 = vmul.f32 %v621_v28, %v579_v14  ;;  %v643_v18 = vmul.f32 %v642_v29, %v579_v14 }
 0x21a   : > { %v664_v19 = vmul.f32 %v663_v30, %v579_v14  ;;  %v685_v17 = vmul.f32 %v684_v33, %v579_v14  ;;  %v706_v20 = vmul.f32 %v705_v34, %v579_v14  ;;  %v727_v21 = vmul.f32 %v726_v35, %v579_v14 }
 0x21b   : > { %v582_v22 = vadd.f32 %v581_v63, %v577_v6  ;;  %v602_v23 = vadd.f32 %v601_v15, %v597_v7  ;;  %v623_v24 = vadd.f32 %v622_v16, %v618_v8  ;;  %v644_v25 = vadd.f32 %v643_v18, %v639_v9 }
 0x21c   : > { %v665_v26 = vadd.f32 %v664_v19, %v660_v10  ;;  %v686_v27 = vadd.f32 %v685_v17, %v681_v11  ;;  %v707_v28 = vadd.f32 %v706_v20, %v702_v12  ;;  %v728_v29 = vadd.f32 %v727_v21, %v723_v13 }
 0x21d   : > { %583 = vst.msk [vmem:[%s342_s27] sm:$0xff] %vm400_vm5, %v582_v22  ;;  %950 = vst.msk [vmem:[%s342_s27 + $0x8] sm:$0xff] %vm400_vm5, %v602_v23 }
 0x21e   : > { %955 = vst.msk [vmem:[%s342_s27 + $0x10] sm:$0xff] %vm400_vm5, %v623_v24  ;;  %960 = vst.msk [vmem:[%s342_s27 + $0x18] sm:$0xff] %vm400_vm5, %v644_v25 }
 0x21f   : > { %965 = vst.msk [vmem:[%s342_s27 + $0x20] sm:$0xff] %vm400_vm5, %v665_v26  ;;  %970 = vst.msk [vmem:[%s342_s27 + $0x28] sm:$0xff] %vm400_vm5, %v686_v27 }
 0x220   : > { %975 = vst.msk [vmem:[%s342_s27 + $0x30] sm:$0xff] %vm400_vm5, %v707_v28  ;;  %980 = vst.msk [vmem:[%s342_s27 + $0x38] sm:$0xff] %vm400_vm5, %v728_v29 }
 0x221   : > { %1225 = shalt.err (!%p1222_p11)
}
 0x222   : > { %s1226_s0 = scalar_lea.hbm %s1800_s8, 1024  ;;  %s1230_s20 = scalar_lea.hbm %s1938_s9, 4096 }
 0x223   : > { %p1227_p2 = scmp.ne.s32.totalorder %s1800_s8, %s1226_s0  ;;  %p1231_p9 = scmp.lt.s32.totalorder %s1800_s8, %s1938_s9 }
 0x224   : > { %p1232_p0 = scmp.lt.s32.totalorder %s1230_s20, %s1226_s0 }
 0x225   : > { %p1228_p4 = pnand %p1227_p2, %p1940_p8 }
 0x226   : > { %p1233_p13 = por %p1232_p0, %p1231_p9 }
 0x227   : > { %p1229_p5 = pneg %p1228_p4 }
 0x229   : > { %p1234_p3 = pnand %p1233_p13, %p1229_p5 }
 0x22b   : > { %1237 = shalt.err (!%p1234_p3)
}
 0x22c   : > { %s1336_s12 = smov 128   ;;  %s1337_s23 = smov 256  }
 0x22d   : > { %s1338_s11 = smov 8  }
 0x22e   : > { %1002 = dma.vmem_to_hbm [thread:$0]  (%p1940_p8), %s1802_s13, 1024, %s1800_s8, %s732_s2, %s1336_s12, %s1337_s23, %s1338_s11  }
 0x22f PF: > { %s1941_s26 = sld [smem:[#allocation26_spill]] }
 0x230   : > { %s1942_s29 = sld [smem:[#allocation19_spill]] }
 0x231   : > { %s1943_s16 = sld [smem:[#allocation28_spill]] }
 0x235   : > { %p1032_p10 = scmp.ge.s32.totalorder %s1941_s26, 2 }
 0x236   : > { %s761_s1 = sand.u32 1, %s1942_s29  }
 0x237   : > { %p1944_p12 = scmp.ne.s32.totalorder %s1943_s16, 0  ;;  %s762_s19 = scalar_lea.sflag [#allocation5], %s761_s1 }
 0x239   : > { %p1022_p7 = pnand %p1032_p10, %p1944_p12 }
 0x23b   : > { %p1023_p1 = pneg %p1022_p7 }
 0x23d   : > { %1287 = dma.done.wait (%p1023_p1), %s762_s19, 1024  }
 0x23e   : > { %1289 = vsyncadd (%p1023_p1), %s762_s19, 4294966272  ;;  %s26_s25 = sadd.s32 1, %s1941_s26   ;;  %s1945_s18 = sld [smem:[#allocation20_spill]] }
 0x23f   : > { %p23_p6 = scmp.ge.s32.totalorder %s26_s25, 6   ;;  %s1946_s19 = sld [smem:[#allocation21_spill]] }
 0x240   : > { %s1947_s20 = sld [smem:[#allocation31_spill]] }
 0x241   : > { %s1948_s21 = sld [smem:[#allocation24_spill]]  ;;  %25 = sbr.rel (!%p23_p6) target bundleno = 18 (0x12), region = 127 }
 0x242   : > { %s1949_s22 = sld [smem:[#allocation25_spill]] }
 0x243   : > { %s1950_s23 = sld [smem:[#allocation29_spill]] }
 0x244   : > { %s1951_s24 = sld [smem:[#allocation30_spill]] }
 0x246   :  { %767 = vsyncpa [#allocation4], 1 }
 0x247   :  { %769 = vsyncpa [#allocation4 + $0x1], 1 }
 0x248   :  { %770 = vsyncpa [#allocation8], 1 }
 0x249   :  { %772 = vsyncpa [#allocation8 + $0x1], 1 }
 0x24a   :  { %773 = vsyncpa [#allocation5], 1 }
 0x24b   :  { %775 = vsyncpa [#allocation5 + $0x1], 1 }
 0x24c   :  { %776 = vsyncpa [#allocation6], 1 }
 0x24d   :  { %778 = vsyncpa [#allocation6 + $0x1], 1 }
 0x24e   :  { %779 = vsyncpa [#allocation11], 1 }

</bundles_post_ra>
